<compile_context>
chip_gen: v5e
topology: v5e:2x2
jax: 0.10.0
libtpu: 0.0.40
codegen_flags: <defaults>
</compile_context>

<pallas_src>
import functools

import numpy as np

import jax
import jax.numpy as jnp
from jax.experimental import pallas as pl
from jax.experimental.pallas import tpu as pltpu


# ------------------------------ fused kernel --------------------------------

def _attention_kernel(x_ref, qkvw_ref, mw_ref, temp_ref, bias_ref, projw_ref,
                      o_ref, *, spatial_w, block_b):
    # x_ref:     (Bt, C, HW)  input block, flattened spatial, f32
    # qkvw_ref:  (3C, C)      1x1 qkv conv weight (Cout, Cin), bf16 (pre-cast)
    # mw_ref:    (9, 3C, HW)  depthwise tap weight * validity mask, f32
    # temp_ref:  (C, 1)       per-row (= per-head) temperature, f32
    # bias_ref:  (C, C)       0 inside a head's block, -1e30 across heads, f32
    # projw_ref: (C, C)       project_out 1x1 conv weight, bf16 (pre-cast)
    # o_ref:     (Bt, C, HW)  output block, f32
    C = qkvw_ref.shape[1]
    HW = x_ref.shape[2]

    qkvw = qkvw_ref[...]                                   # (3C, C)  bf16
    projw = projw_ref[...]                                 # (C, C)   bf16
    temp = temp_ref[...]                                   # (C, 1)   f32
    bias = bias_ref[...]                                   # (C, C)   f32

    # Static unroll over the batch block: amortizes the ~0.35us per-grid-step
    # fixed overhead without adding any cross-batch data movement.
    for b in range(block_b):
        x = x_ref[b]                                       # (C, HW) f32

        # ---- 1x1 qkv conv (MXU: bf16 operands, f32 accumulation) ----
        qkv = jnp.dot(qkvw, x.astype(jnp.bfloat16),
                      preferred_element_type=jnp.float32)  # (3C, HW)

        # ---- depthwise 3x3 conv, stride 1, zero pad 1 ----
        # Each tap is an XLU lane rotation + one fused mask*weight multiply.
        # The masks inside mw zero every out-of-bounds / wrapped position, so
        # the roll wraparound never contributes.
        acc = qkv * mw_ref[4]                              # center tap
        for idx in range(9):
            if idx == 4:
                continue
            dy, dx = idx // 3, idx % 3
            s = (dy - 1) * spatial_w + (dx - 1)            # flat read offset
            tap = pltpu.roll(qkv, (-s) % HW, axis=1)       # out[l] = qkv[l+s]
            acc = acc + tap * mw_ref[idx]
        q = acc[:C]
        k = acc[C:2 * C]
        v = acc[2 * C:]                                    # each (C, HW) f32

        # ---- F.normalize(q/k, dim=-1), eps = 1e-12 (EUP rsqrt) ----
        inv_q = jnp.minimum(
            jax.lax.rsqrt(jnp.sum(q * q, axis=1, keepdims=True)), 1e12)
        inv_k = jnp.minimum(
            jax.lax.rsqrt(jnp.sum(k * k, axis=1, keepdims=True)), 1e12)
        qn = q * (inv_q * temp)          # temperature folded into q rows
        kn = k * inv_k

        # ---- all heads' gram matrices as ONE (C, C) matmul (contract HW) ----
        # f32 operands: MXU is idle at these shapes, saves VPU pack casts.
        gram = jax.lax.dot_general(
            qn, kn, dimension_numbers=(((1,), (1,)), ((), ())),
            preferred_element_type=jnp.float32) + bias     # (C, C)

        # row softmax == per-head softmax because off-block entries are -1e30
        gram = gram - jnp.max(gram, axis=1, keepdims=True)
        e = jnp.exp(gram)
        # approx reciprocal (EUP): ~1e-6 rel. error; use exact divide if
        # strict parity with the PyTorch reference is required.
        p = e * pl.reciprocal(jnp.sum(e, axis=1, keepdims=True), approx=True)

        out = jnp.dot(p, v, preferred_element_type=jnp.float32)   # (C, HW)

        # ---- project_out 1x1 conv ----
        o_ref[b] = jnp.dot(projw, out.astype(jnp.bfloat16),
                           preferred_element_type=jnp.float32)    # (C, HW)


# --------------------------- static helper tables ---------------------------

def _dw_tap_masks(H, W):
    """(9, H*W) f32: 1 where tap (dy,dx) reads in-bounds, else 0.

    Also zeroes every position whose flat-shift would wrap across a row or
    across the flat array, which is what makes pltpu.roll legal in-kernel.
    """
    HW = H * W
    rows = np.arange(HW) // W
    cols = np.arange(HW) % W
    masks = np.zeros((9, HW), np.float32)
    for idx in range(9):
        sy, sx = idx // 3 - 1, idx % 3 - 1
        valid = ((rows + sy >= 0) & (rows + sy < H) &
                 (cols + sx >= 0) & (cols + sx < W))
        masks[idx] = valid.astype(np.float32)
    return masks


def _head_block_bias(C, num_heads):
    """(C, C) f32 additive mask: 0 inside a head's block, -1e30 across heads."""
    ch = C // num_heads
    head = np.arange(C) // ch
    same = head[:, None] == head[None, :]
    return jnp.asarray(np.where(same, 0.0, -1e30).astype(np.float32))


def _pick_block_b(B, max_block=8):
    """Largest divisor of B that is <= max_block while keeping >= 2 grid
    steps (v7x has 2 TensorCores; a 1-step grid idles one of them)."""
    for bt in range(min(B, max_block), 0, -1):
        if B % bt == 0 and (B // bt >= 2 or B == 1):
            return bt
    return 1


# ------------------------------ module wrapper -------------------------------

def init_params(key, dim=32, num_heads=4):
    k1, k2, k3 = jax.random.split(key, 3)
    s = 0.05
    return {
        # 1x1 conv weights stored as (Cout, Cin) so y = W @ x in (C, HW) layout
        'qkv_w': jax.random.normal(k1, (3 * dim, dim), jnp.float32) * s,
        # depthwise 3x3 weight: (3*dim, 9), column index = dy*3 + dx
        'qkv_dw': jax.random.normal(k2, (3 * dim, 9), jnp.float32) * s,
        'proj_w': jax.random.normal(k3, (dim, dim), jnp.float32) * s,
        'temperature': jnp.ones((num_heads,), jnp.float32),
    }


def attention_forward(params, x, *, num_heads):
    """x: (B, C, H, W) float32 (NCHW, same as the PyTorch module)."""
    B, C, H, W = x.shape
    HW = H * W
    C3 = 3 * C
    ch = C // num_heads
    Bt = _pick_block_b(B)

    # metadata-only reshape (merges trailing dims, no HBM relayout)
    x_flat = x.reshape(B, C, HW).astype(jnp.float32)

    # pre-fused tap table: depthwise weight * validity mask -> (9, 3C, HW)
    masks = jnp.asarray(_dw_tap_masks(H, W))                      # (9, HW)
    mw = params['qkv_dw'].T[:, :, None] * masks[:, None, :]       # (9, 3C, HW)

    bias = _head_block_bias(C, num_heads)                         # (C, C)
    temp_col = jnp.repeat(params['temperature'], ch).reshape(C, 1)

    # pre-cast 1x1 conv weights once (no per-grid-step f32->bf16 packs)
    qkv_w_bf16 = params['qkv_w'].astype(jnp.bfloat16)
    proj_w_bf16 = params['proj_w'].astype(jnp.bfloat16)

    kernel = functools.partial(_attention_kernel, spatial_w=W, block_b=Bt)

    y = pl.pallas_call(
        kernel,
        out_shape=jax.ShapeDtypeStruct((B, C, HW), jnp.float32),
        grid=(B // Bt,),
        in_specs=[
            pl.BlockSpec((Bt, C, HW), lambda b: (b, 0, 0)),   # x (batch block)
            pl.BlockSpec((C3, C), lambda b: (0, 0)),          # qkv_w (bf16)
            pl.BlockSpec((9, C3, HW), lambda b: (0, 0, 0)),   # tap weight*mask
            pl.BlockSpec((C, 1), lambda b: (0, 0)),           # temperature/row
            pl.BlockSpec((C, C), lambda b: (0, 0)),           # head-block bias
            pl.BlockSpec((C, C), lambda b: (0, 0)),           # proj_w (bf16)
        ],
        out_specs=pl.BlockSpec((Bt, C, HW), lambda b: (b, 0, 0)),
        compiler_params=pltpu.CompilerParams(
            dimension_semantics=("parallel",)),
    )(x_flat, qkv_w_bf16, mw, temp_col, bias, proj_w_bf16)

    return y.reshape(B, C, H, W)


if __name__ == "__main__":
    B, dim, H, W = 2, 32, 16, 16
    num_heads = 4

    key = jax.random.PRNGKey(0)
    kp, kx = jax.random.split(key)
    params = init_params(kp, dim=dim, num_heads=num_heads)
    x = jax.random.normal(kx, (B, dim, H, W), jnp.float32)

    fwd = jax.jit(functools.partial(attention_forward, num_heads=num_heads))
    out = fwd(params, x)
    jax.block_until_ready(out)

    assert out.shape == (B, dim, H, W)
    assert jnp.all(jnp.isfinite(out))
    print("KERNEL_OK")
</pallas_src>

<mosaic_0001>
module attributes {stable_mosaic.version = 11 : i64} {
  func.func @_attention_kernel(%arg0: i32, %arg1: memref<1x32x256xf32, #tpu.memory_space<vmem>>, %arg2: memref<96x32xbf16, #tpu.memory_space<vmem>>, %arg3: memref<9x96x256xf32, #tpu.memory_space<vmem>>, %arg4: memref<32x1xf32, #tpu.memory_space<vmem>>, %arg5: memref<32x32xf32, #tpu.memory_space<vmem>>, %arg6: memref<32x32xbf16, #tpu.memory_space<vmem>>, %arg7: memref<1x32x256xf32, #tpu.memory_space<vmem>>) attributes {dimension_semantics = [#tpu.dimension_semantics<parallel>], iteration_bounds = array<i64: 2>, scalar_prefetch = 0 : i64, scratch_operands = 0 : i64, tpu.core_type = #tpu.core_type<tc>, window_params = [{transform_indices = @transform_0, window_bounds = array<i64: 1, 32, 256>}, {pipeline_mode = #tpu.pipeline_mode<synchronous>, transform_indices = @transform_1, window_bounds = array<i64: 96, 32>}, {pipeline_mode = #tpu.pipeline_mode<synchronous>, transform_indices = @transform_2, window_bounds = array<i64: 9, 96, 256>}, {pipeline_mode = #tpu.pipeline_mode<synchronous>, transform_indices = @transform_3, window_bounds = array<i64: 32, 1>}, {pipeline_mode = #tpu.pipeline_mode<synchronous>, transform_indices = @transform_4, window_bounds = array<i64: 32, 32>}, {pipeline_mode = #tpu.pipeline_mode<synchronous>, transform_indices = @transform_5, window_bounds = array<i64: 32, 32>}, {transform_indices = @transform_6, window_bounds = array<i64: 1, 32, 256>}]} {
    %c0 = arith.constant 0 : index
    %c0_0 = arith.constant 0 : index
    %0 = vector.load %arg2[%c0, %c0_0] : memref<96x32xbf16, #tpu.memory_space<vmem>>, vector<96x32xbf16>
    %c0_1 = arith.constant 0 : index
    %c0_2 = arith.constant 0 : index
    %1 = vector.load %arg6[%c0_1, %c0_2] : memref<32x32xbf16, #tpu.memory_space<vmem>>, vector<32x32xbf16>
    %c0_3 = arith.constant 0 : index
    %c0_4 = arith.constant 0 : index
    %2 = vector.load %arg4[%c0_3, %c0_4] : memref<32x1xf32, #tpu.memory_space<vmem>>, vector<32x1xf32>
    %c0_5 = arith.constant 0 : index
    %c0_6 = arith.constant 0 : index
    %3 = vector.load %arg5[%c0_5, %c0_6] : memref<32x32xf32, #tpu.memory_space<vmem>>, vector<32x32xf32>
    %c0_7 = arith.constant 0 : index
    %c0_8 = arith.constant 0 : index
    %c0_9 = arith.constant 0 : index
    %4 = vector.load %arg1[%c0_7, %c0_8, %c0_9] : memref<1x32x256xf32, #tpu.memory_space<vmem>>, vector<1x32x256xf32>
    %5 = vector.shape_cast %4 : vector<1x32x256xf32> to vector<32x256xf32>
    %6 = arith.truncf %5 : vector<32x256xf32> to vector<32x256xbf16>
    %cst = arith.constant dense<0.000000e+00> : vector<96x256xf32>
    %7 = tpu.matmul %0, %6, %cst {dimension_numbers = #tpu.dot_dimension_numbers<[1], [0], [0], [1], [0, 0, 1, 1], [], []>} : vector<96x32xbf16>, vector<32x256xbf16>, vector<96x256xf32> -> vector<96x256xf32>
    %c4 = arith.constant 4 : index
    %c0_10 = arith.constant 0 : index
    %c0_11 = arith.constant 0 : index
    %8 = vector.load %arg3[%c4, %c0_10, %c0_11] : memref<9x96x256xf32, #tpu.memory_space<vmem>>, vector<1x96x256xf32>
    %9 = vector.shape_cast %8 : vector<1x96x256xf32> to vector<96x256xf32>
    %10 = arith.mulf %7, %9 : vector<96x256xf32>
    %c17_i32 = arith.constant 17 : i32
    %11 = tpu.dynamic_rotate %7 by %c17_i32 dim 1 : vector<96x256xf32>, i32 -> vector<96x256xf32>
    %c0_12 = arith.constant 0 : index
    %c0_13 = arith.constant 0 : index
    %c0_14 = arith.constant 0 : index
    %12 = vector.load %arg3[%c0_12, %c0_13, %c0_14] : memref<9x96x256xf32, #tpu.memory_space<vmem>>, vector<1x96x256xf32>
    %13 = vector.shape_cast %12 : vector<1x96x256xf32> to vector<96x256xf32>
    %14 = arith.mulf %11, %13 : vector<96x256xf32>
    %15 = arith.addf %10, %14 : vector<96x256xf32>
    %c16_i32 = arith.constant 16 : i32
    %16 = tpu.dynamic_rotate %7 by %c16_i32 dim 1 : vector<96x256xf32>, i32 -> vector<96x256xf32>
    %c1 = arith.constant 1 : index
    %c0_15 = arith.constant 0 : index
    %c0_16 = arith.constant 0 : index
    %17 = vector.load %arg3[%c1, %c0_15, %c0_16] : memref<9x96x256xf32, #tpu.memory_space<vmem>>, vector<1x96x256xf32>
    %18 = vector.shape_cast %17 : vector<1x96x256xf32> to vector<96x256xf32>
    %19 = arith.mulf %16, %18 : vector<96x256xf32>
    %20 = arith.addf %15, %19 : vector<96x256xf32>
    %c15_i32 = arith.constant 15 : i32
    %21 = tpu.dynamic_rotate %7 by %c15_i32 dim 1 : vector<96x256xf32>, i32 -> vector<96x256xf32>
    %c2 = arith.constant 2 : index
    %c0_17 = arith.constant 0 : index
    %c0_18 = arith.constant 0 : index
    %22 = vector.load %arg3[%c2, %c0_17, %c0_18] : memref<9x96x256xf32, #tpu.memory_space<vmem>>, vector<1x96x256xf32>
    %23 = vector.shape_cast %22 : vector<1x96x256xf32> to vector<96x256xf32>
    %24 = arith.mulf %21, %23 : vector<96x256xf32>
    %25 = arith.addf %20, %24 : vector<96x256xf32>
    %c1_i32 = arith.constant 1 : i32
    %26 = tpu.dynamic_rotate %7 by %c1_i32 dim 1 : vector<96x256xf32>, i32 -> vector<96x256xf32>
    %c3 = arith.constant 3 : index
    %c0_19 = arith.constant 0 : index
    %c0_20 = arith.constant 0 : index
    %27 = vector.load %arg3[%c3, %c0_19, %c0_20] : memref<9x96x256xf32, #tpu.memory_space<vmem>>, vector<1x96x256xf32>
    %28 = vector.shape_cast %27 : vector<1x96x256xf32> to vector<96x256xf32>
    %29 = arith.mulf %26, %28 : vector<96x256xf32>
    %30 = arith.addf %25, %29 : vector<96x256xf32>
    %c255_i32 = arith.constant 255 : i32
    %31 = tpu.dynamic_rotate %7 by %c255_i32 dim 1 : vector<96x256xf32>, i32 -> vector<96x256xf32>
    %c5 = arith.constant 5 : index
    %c0_21 = arith.constant 0 : index
    %c0_22 = arith.constant 0 : index
    %32 = vector.load %arg3[%c5, %c0_21, %c0_22] : memref<9x96x256xf32, #tpu.memory_space<vmem>>, vector<1x96x256xf32>
    %33 = vector.shape_cast %32 : vector<1x96x256xf32> to vector<96x256xf32>
    %34 = arith.mulf %31, %33 : vector<96x256xf32>
    %35 = arith.addf %30, %34 : vector<96x256xf32>
    %c241_i32 = arith.constant 241 : i32
    %36 = tpu.dynamic_rotate %7 by %c241_i32 dim 1 : vector<96x256xf32>, i32 -> vector<96x256xf32>
    %c6 = arith.constant 6 : index
    %c0_23 = arith.constant 0 : index
    %c0_24 = arith.constant 0 : index
    %37 = vector.load %arg3[%c6, %c0_23, %c0_24] : memref<9x96x256xf32, #tpu.memory_space<vmem>>, vector<1x96x256xf32>
    %38 = vector.shape_cast %37 : vector<1x96x256xf32> to vector<96x256xf32>
    %39 = arith.mulf %36, %38 : vector<96x256xf32>
    %40 = arith.addf %35, %39 : vector<96x256xf32>
    %c240_i32 = arith.constant 240 : i32
    %41 = tpu.dynamic_rotate %7 by %c240_i32 dim 1 : vector<96x256xf32>, i32 -> vector<96x256xf32>
    %c7 = arith.constant 7 : index
    %c0_25 = arith.constant 0 : index
    %c0_26 = arith.constant 0 : index
    %42 = vector.load %arg3[%c7, %c0_25, %c0_26] : memref<9x96x256xf32, #tpu.memory_space<vmem>>, vector<1x96x256xf32>
    %43 = vector.shape_cast %42 : vector<1x96x256xf32> to vector<96x256xf32>
    %44 = arith.mulf %41, %43 : vector<96x256xf32>
    %45 = arith.addf %40, %44 : vector<96x256xf32>
    %c239_i32 = arith.constant 239 : i32
    %46 = tpu.dynamic_rotate %7 by %c239_i32 dim 1 : vector<96x256xf32>, i32 -> vector<96x256xf32>
    %c8 = arith.constant 8 : index
    %c0_27 = arith.constant 0 : index
    %c0_28 = arith.constant 0 : index
    %47 = vector.load %arg3[%c8, %c0_27, %c0_28] : memref<9x96x256xf32, #tpu.memory_space<vmem>>, vector<1x96x256xf32>
    %48 = vector.shape_cast %47 : vector<1x96x256xf32> to vector<96x256xf32>
    %49 = arith.mulf %46, %48 : vector<96x256xf32>
    %50 = arith.addf %45, %49 : vector<96x256xf32>
    %51 = vector.extract_strided_slice %50 {offsets = [0, 0], sizes = [32, 256], strides = [1, 1]} : vector<96x256xf32> to vector<32x256xf32>
    %52 = vector.extract_strided_slice %50 {offsets = [32, 0], sizes = [32, 256], strides = [1, 1]} : vector<96x256xf32> to vector<32x256xf32>
    %53 = vector.extract_strided_slice %50 {offsets = [64, 0], sizes = [32, 256], strides = [1, 1]} : vector<96x256xf32> to vector<32x256xf32>
    %54 = arith.mulf %51, %51 : vector<32x256xf32>
    %cst_29 = arith.constant dense<0.000000e+00> : vector<32xf32>
    %55 = vector.multi_reduction <add>, %54, %cst_29 [1] : vector<32x256xf32> to vector<32xf32>
    %56 = vector.shape_cast %55 : vector<32xf32> to vector<32x1xf32>
    %57 = math.rsqrt %56 : vector<32x1xf32>
    %cst_30 = arith.constant 9.99999995E+11 : f32
    %58 = vector.broadcast %cst_30 : f32 to vector<32x1xf32>
    %59 = arith.minimumf %57, %58 : vector<32x1xf32>
    %60 = arith.mulf %52, %52 : vector<32x256xf32>
    %cst_31 = arith.constant dense<0.000000e+00> : vector<32xf32>
    %61 = vector.multi_reduction <add>, %60, %cst_31 [1] : vector<32x256xf32> to vector<32xf32>
    %62 = vector.shape_cast %61 : vector<32xf32> to vector<32x1xf32>
    %63 = math.rsqrt %62 : vector<32x1xf32>
    %cst_32 = arith.constant 9.99999995E+11 : f32
    %64 = vector.broadcast %cst_32 : f32 to vector<32x1xf32>
    %65 = arith.minimumf %63, %64 : vector<32x1xf32>
    %66 = arith.mulf %59, %2 : vector<32x1xf32>
    %67 = vector.broadcast %66 : vector<32x1xf32> to vector<32x256xf32>
    %68 = arith.mulf %51, %67 : vector<32x256xf32>
    %69 = vector.broadcast %65 : vector<32x1xf32> to vector<32x256xf32>
    %70 = arith.mulf %52, %69 : vector<32x256xf32>
    %cst_33 = arith.constant dense<0.000000e+00> : vector<32x32xf32>
    %71 = tpu.matmul %68, %70, %cst_33 {dimension_numbers = #tpu.dot_dimension_numbers<[1], [1], [0], [0], [0, 0, 1, 0], [], []>} : vector<32x256xf32>, vector<32x256xf32>, vector<32x32xf32> -> vector<32x32xf32>
    %72 = arith.addf %71, %3 : vector<32x32xf32>
    %cst_34 = arith.constant dense<0xFF800000> : vector<32xf32>
    %73 = vector.multi_reduction <maximumf>, %72, %cst_34 [1] : vector<32x32xf32> to vector<32xf32>
    %74 = vector.shape_cast %73 : vector<32xf32> to vector<32x1xf32>
    %75 = vector.broadcast %74 : vector<32x1xf32> to vector<32x32xf32>
    %76 = arith.subf %72, %75 : vector<32x32xf32>
    %77 = math.exp %76 : vector<32x32xf32>
    %cst_35 = arith.constant dense<0.000000e+00> : vector<32xf32>
    %78 = vector.multi_reduction <add>, %77, %cst_35 [1] : vector<32x32xf32> to vector<32xf32>
    %79 = vector.shape_cast %78 : vector<32xf32> to vector<32x1xf32>
    %80 = tpu.reciprocal %79 {approx = true} : vector<32x1xf32> -> vector<32x1xf32>
    %81 = vector.broadcast %80 : vector<32x1xf32> to vector<32x32xf32>
    %82 = arith.mulf %77, %81 : vector<32x32xf32>
    %cst_36 = arith.constant dense<0.000000e+00> : vector<32x256xf32>
    %83 = tpu.matmul %82, %53, %cst_36 {dimension_numbers = #tpu.dot_dimension_numbers<[1], [0], [0], [1], [0, 0, 1, 1], [], []>} : vector<32x32xf32>, vector<32x256xf32>, vector<32x256xf32> -> vector<32x256xf32>
    %84 = arith.truncf %83 : vector<32x256xf32> to vector<32x256xbf16>
    %cst_37 = arith.constant dense<0.000000e+00> : vector<32x256xf32>
    %85 = tpu.matmul %1, %84, %cst_37 {dimension_numbers = #tpu.dot_dimension_numbers<[1], [0], [0], [1], [0, 0, 1, 1], [], []>} : vector<32x32xbf16>, vector<32x256xbf16>, vector<32x256xf32> -> vector<32x256xf32>
    %c0_38 = arith.constant 0 : index
    %c0_39 = arith.constant 0 : index
    %c0_40 = arith.constant 0 : index
    %86 = vector.load %arg7[%c0_38, %c0_39, %c0_40] : memref<1x32x256xf32, #tpu.memory_space<vmem>>, vector<1x32x256xf32>
    %87 = vector.shape_cast %86 : vector<1x32x256xf32> to vector<32x256xf32>
    %88 = vector.shape_cast %85 : vector<32x256xf32> to vector<1x32x256xf32>
    tpu.vector_store %arg7[%c0_38, %c0_39, %c0_40], %88 {strides = array<i32>} : memref<1x32x256xf32, #tpu.memory_space<vmem>>, vector<1x32x256xf32>,
    return
  }
  func.func @transform_0(%arg0: i32) -> (i32, i32, i32) {
    %c0_i32 = arith.constant 0 : i32
    %c0_i32_0 = arith.constant 0 : i32
    %c0_i32_1 = arith.constant 0 : i32
    return %arg0, %c0_i32, %c0_i32_0 : i32, i32, i32
  }
  func.func @transform_1(%arg0: i32) -> (i32, i32) {
    %c0_i32 = arith.constant 0 : i32
    %c0_i32_0 = arith.constant 0 : i32
    %c0_i32_1 = arith.constant 0 : i32
    return %c0_i32, %c0_i32_0 : i32, i32
  }
  func.func @transform_2(%arg0: i32) -> (i32, i32, i32) {
    %c0_i32 = arith.constant 0 : i32
    %c0_i32_0 = arith.constant 0 : i32
    %c0_i32_1 = arith.constant 0 : i32
    %c0_i32_2 = arith.constant 0 : i32
    return %c0_i32, %c0_i32_0, %c0_i32_1 : i32, i32, i32
  }
  func.func @transform_3(%arg0: i32) -> (i32, i32) {
    %c0_i32 = arith.constant 0 : i32
    %c0_i32_0 = arith.constant 0 : i32
    %c0_i32_1 = arith.constant 0 : i32
    return %c0_i32, %c0_i32_0 : i32, i32
  }
  func.func @transform_4(%arg0: i32) -> (i32, i32) {
    %c0_i32 = arith.constant 0 : i32
    %c0_i32_0 = arith.constant 0 : i32
    %c0_i32_1 = arith.constant 0 : i32
    return %c0_i32, %c0_i32_0 : i32, i32
  }
  func.func @transform_5(%arg0: i32) -> (i32, i32) {
    %c0_i32 = arith.constant 0 : i32
    %c0_i32_0 = arith.constant 0 : i32
    %c0_i32_1 = arith.constant 0 : i32
    return %c0_i32, %c0_i32_0 : i32, i32
  }
  func.func @transform_6(%arg0: i32) -> (i32, i32, i32) {
    %c0_i32 = arith.constant 0 : i32
    %c0_i32_0 = arith.constant 0 : i32
    %c0_i32_1 = arith.constant 0 : i32
    return %arg0, %c0_i32, %c0_i32_0 : i32, i32, i32
  }
}

</mosaic_0001>

<bundles_post_ra>
// kernel: attention_forward.1
= control target key start
LH: loop header
LB: loop body
LE: loop exit
PB: predicated region body
PF: predicated region fallthrough
CT: control target
= control target key end

     0   :  { %s2468_s21 = smov 0   ;;  %s4704_s0 = inlined_call_operand.vmem [shape: f32[2,32,256], index: 0, kind: input, shape index: {}]   ;;  %s4705_s1 = inlined_call_operand.vmem [shape: bf16[96,32], index: 1, kind: input, shape index: {}]   ;;  %s4706_s2 = inlined_call_operand.vmem [shape: f32[9,96,256], index: 2, kind: input, shape index: {}]   ;;  %s4707_s3 = inlined_call_operand.vmem [shape: f32[32,1], index: 3, kind: input, shape index: {}]   ;;  %s4708_s4 = inlined_call_operand.vmem [shape: f32[32,32], index: 4, kind: input, shape index: {}]   ;;  %s4709_s5 = inlined_call_operand.vmem [shape: bf16[32,32], index: 5, kind: input, shape index: {}]   ;;  %s4710_s6 = inlined_call_operand.vmem [shape: f32[2,32,256], index: 6, kind: output, shape index: {}]  }
   0x1 LB: > { %s2095_s22 = sadd.s32 4294967295, %s2422_s21   ;;  %p2099_p0 = scmp.ge.s32.totalorder %s2422_s21, 1  ;;  %s2422_s21 = sphi %s2468_s21, %s16_s21  }
   0x2   : > { %p212_p1 = scmp.lt.s32.totalorder %s2422_s21, 3 }
   0x4   : > { %p213_p2 = pnand %p2099_p0, %p212_p1 }
   0x6   : > { %216 = sbr.rel (%p213_p2) target bundleno = 1530 (0x5fa), region = 44 }
   0xb   : > { %p242_p3 = scmp.lt.s32.totalorder %s2095_s22, 1  ;;  %v2356_v12 = vld [vmem:[%s4705_s1] sm:$0xff]  ;;  %vm319_vm0 = vcmask 261120   ;;  %v2357_v13 = vld [vmem:[%s4705_s1 + $0x8] sm:$0xff]  ;;  %v2358_v14 = vld [vmem:[%s4705_s1 + $0x10] sm:$0xff]  ;;  %s2424_s11 = smov 15  }
   0xc   : > { %v2359_v15 = vld [vmem:[%s4705_s1 + $0x18] sm:$0xff]  ;;  %s2425_s12 = smov 16   ;;  %s2426_s13 = smov 17  }
   0xd   : > { %s4836_s22 = smov (!%p242_p3, %s2095_s22), 1  ;;  %s2427_s14 = smov 127  }
   0xe   : > { %s2354_s23 = sshll.u32 %s4836_s22, 6  ;;  %s2428_s15 = smov 1  }
   0xf   : > { %s246_s26 = scalar_lea.vmem %s4704_s0, %s2354_s23  ;;  %s2429_s16 = smov 113  }
  0x10   : > { %v281_v0 = vld [vmem:[%s246_s26 + $0x20] sm:$0xff]  ;;  %v283_v1 = vld [vmem:[%s246_s26 + $0x30] sm:$0xff]  ;;  %v282_v2 = vld [vmem:[%s246_s26 + $0x28] sm:$0xff]  ;;  %s2430_s17 = smov 111   ;;  %s2431_s18 = smov 112  }
  0x11   : > { %v287_v3 = vpack.c.bf16 %v283_v1, %v281_v0  ;;  %v284_v4 = vld [vmem:[%s246_s26 + $0x38] sm:$0xff]  ;;  %v277_v5 = vld [vmem:[%s246_s26] sm:$0xff]  ;;  %v279_v6 = vld [vmem:[%s246_s26 + $0x10] sm:$0xff] }
  0x12   : > { %v288_v7 = vpack.c.bf16 %v284_v4, %v282_v2  ;;  %v278_v8 = vld [vmem:[%s246_s26 + $0x8] sm:$0xff]  ;;  %v280_v9 = vld [vmem:[%s246_s26 + $0x18] sm:$0xff]  ;;  %v285_v10 = vpack.c.bf16 %v279_v6, %v277_v5 }
  0x13   : > { %344 = vmatpush.bf16.msra.mxu0 %v287_v3  ;;  %v286_v11 = vpack.c.bf16 %v280_v9, %v278_v8 }
  0x14   : > { %383 = vmatpush.bf16.msra.mxu1 %v288_v7 }
  0x17   : > { %345 = vmatpush.bf16.msra.mxu0 %v285_v10 }
  0x18   : > { %384 = vmatpush.bf16.msra.mxu1 %v286_v11 }
  0x1a   : > { %2128 = vmatmul.msk.bf16.vlgmr.msra.gmra.mxu0 %vm319_vm0, %v2356_v12 }
  0x1b   : > { %2134 = vmatmul.msk.bf16.vlgmr.msra.gmra.mxu1 %vm319_vm0, %v2356_v12 }
  0x2a   : > { %2129 = vmatmul.msk.bf16.gmra.mxu0 %vm319_vm0, %v2357_v13 }
  0x2b   : > { %2135 = vmatmul.msk.bf16.gmra.mxu1 %vm319_vm0, %v2357_v13 }
  0x3a   : > { %2130 = vmatmul.msk.bf16.gmra.mxu0 %vm319_vm0, %v2358_v14 }
  0x3b   : > { %2136 = vmatmul.msk.bf16.gmra.mxu1 %vm319_vm0, %v2358_v14 }
  0x4a   : > { %2131 = vmatmul.msk.bf16.gmra.mxu0 %vm319_vm0, %v2359_v15 }
  0x4b   : > { %2137 = vmatmul.msk.bf16.gmra.mxu1 %vm319_vm0, %v2359_v15 }
  0x97   : > { %v2504_v16 = vpop.f32.mrf.mxu0 }
  0x98   : > { %758 = vrot.lane.b32.xlu2 %v2504_v16, %s2424_s11  ;;  %612 = vrot.lane.b32.xlu1 %v2504_v16, %s2425_s12  ;;  %v2512_v17 = vpop.f32.mrf.mxu1 }
  0x99   : > { %465 = vrot.lane.b32.xlu0 %v2504_v16, %s2426_s13 }
  0x9f   : > { %v2538_v18 = vpop.f32.mrf.mxu0 }
  0xa0   : > { %782 = vrot.lane.b32.xlu2 %v2512_v17, %s2424_s11  ;;  %636 = vrot.lane.b32.xlu1 %v2512_v17, %s2425_s12  ;;  %v2540_v19 = vpop.f32.mrf.mxu1 }
  0xa1   : > { %489 = vrot.lane.b32.xlu0 %v2512_v17, %s2426_s13 }
  0xa7   : > { %v2580_v21 = vpop.f32.mrf.mxu0 }
  0xa8   : > { %1074 = vrot.lane.b32.xlu2 %v2512_v17, %s2427_s14  ;;  %928 = vrot.lane.b32.xlu1 %v2512_v17, %s2428_s15  ;;  %v2572_v20 = vpop.f32.mrf.mxu1 }
  0xa9   : > { %904 = vrot.lane.b32.xlu0 %v2504_v16, %s2428_s15 }
  0xaf   : > { %v2630_v31 = vpop.f32.mrf.mxu0 }
  0xb0   : > { %1196 = vrot.lane.b32.xlu2 %v2504_v16, %s2429_s16  ;;  %1050 = vrot.lane.b32.xlu1 %v2504_v16, %s2427_s14  ;;  %v2606_v25 = vpop.f32.mrf.mxu1 }
  0xb1   : > { %1220 = vrot.lane.b32.xlu0 %v2512_v17, %s2429_s16 }
  0xb7   : > { %v2644_v35 = vpop.f32.mrf.mxu0 }
  0xb8   : > { %1512 = vrot.lane.b32.xlu2 %v2512_v17, %s2430_s17  ;;  %1366 = vrot.lane.b32.xlu1 %v2512_v17, %s2431_s18  ;;  %v2648_v37 = vpop.f32.mrf.mxu1 }
  0xb9   : > { %1342 = vrot.lane.b32.xlu0 %v2504_v16, %s2431_s18 }
  0xbf   : > { %v2662_v41 = vpop.f32.mrf.mxu0 }
  0xc0   : > { %1488 = vrot.lane.b32.xlu1 %v2504_v16, %s2430_s17  ;;  %467 = vrot.lane.b32.xlu2 %v2538_v18, %s2426_s13  ;;  %v2664_v42 = vpop.f32.mrf.mxu1 }
  0xc1   : > { %491 = vrot.lane.b32.xlu0 %v2540_v19, %s2426_s13 }
  0xc7   : > { %v2678_v46 = vpop.f32.mrf.mxu0 }
  0xc8   : > { %638 = vrot.lane.b32.xlu1 %v2540_v19, %s2425_s12  ;;  %784 = vrot.lane.b32.xlu2 %v2540_v19, %s2424_s11  ;;  %v2692_v50 = vpop.f32.mrf.mxu1 }
  0xc9   : > { %614 = vrot.lane.b32.xlu0 %v2538_v18, %s2425_s12 }
  0xcf   : > { %v2706_v54 = vpop.f32.mrf.mxu0 }
  0xd0   : > { %760 = vrot.lane.b32.xlu1 %v2538_v18, %s2424_s11  ;;  %906 = vrot.lane.b32.xlu2 %v2538_v18, %s2428_s15  ;;  %v2720_v58 = vpop.f32.mrf.mxu1 }
  0xd1   : > { %930 = vrot.lane.b32.xlu0 %v2540_v19, %s2428_s15 }
  0xd8   : > { %1222 = vrot.lane.b32.xlu1 %v2540_v19, %s2429_s16  ;;  %1052 = vrot.lane.b32.xlu2 %v2538_v18, %s2427_s14 }
  0xd9   : > { %1076 = vrot.lane.b32.xlu0 %v2540_v19, %s2427_s14 }
  0xe0   : > { %1344 = vrot.lane.b32.xlu1 %v2538_v18, %s2431_s18  ;;  %1368 = vrot.lane.b32.xlu2 %v2540_v19, %s2431_s18 }
  0xe1   : > { %1198 = vrot.lane.b32.xlu0 %v2538_v18, %s2429_s16 }
  0xe8   : > { %493 = vrot.lane.b32.xlu1 %v2572_v20, %s2426_s13  ;;  %1490 = vrot.lane.b32.xlu2 %v2538_v18, %s2430_s17 }
  0xe9   : > { %1514 = vrot.lane.b32.xlu0 %v2540_v19, %s2430_s17 }
  0xf0   : > { %640 = vrot.lane.b32.xlu2 %v2572_v20, %s2425_s12  ;;  %616 = vrot.lane.b32.xlu1 %v2580_v21, %s2425_s12 }
  0xf1   : > { %469 = vrot.lane.b32.xlu0 %v2580_v21, %s2426_s13 }
  0xf2   : > { %v2588_v22 = vpop.permute.xlu2 %758 }
  0xf8   : > { %762 = vrot.lane.b32.xlu2 %v2580_v21, %s2424_s11  ;;  %932 = vrot.lane.b32.xlu1 %v2572_v20, %s2428_s15 }
  0xf9   : > { %786 = vrot.lane.b32.xlu0 %v2572_v20, %s2424_s11 }
  0xfa   : > { %v2596_v23 = vpop.permute.xlu2 %782 }
 0x100   : > { %1492 = vrot.lane.b32.xlu2 %v2580_v21, %s2430_s17  ;;  %1078 = vrot.lane.b32.xlu1 %v2572_v20, %s2427_s14 }
 0x101   : > { %908 = vrot.lane.b32.xlu0 %v2580_v21, %s2428_s15 }
 0x102   : > { %v2604_v24 = vpop.permute.xlu2 %1074 }
 0x108   : > { %495 = vrot.lane.b32.xlu2 %v2606_v25, %s2426_s13  ;;  %1224 = vrot.lane.b32.xlu1 %v2572_v20, %s2429_s16 }
 0x109   : > { %1054 = vrot.lane.b32.xlu0 %v2580_v21, %s2427_s14 }
 0x10a   : > { %v2614_v26 = vpop.permute.xlu2 %1196  ;;  %v2616_v27 = vpop.permute.xlu1 %612 }
 0x10b   : > { %v2618_v28 = vpop.permute.xlu0 %465 }
 0x110   : > { %642 = vrot.lane.b32.xlu2 %v2606_v25, %s2425_s12  ;;  %1370 = vrot.lane.b32.xlu1 %v2572_v20, %s2431_s18 }
 0x111   : > { %1200 = vrot.lane.b32.xlu0 %v2580_v21, %s2429_s16 }
 0x112   : > { %v2626_v29 = vpop.permute.xlu2 %1512  ;;  %v2628_v30 = vpop.permute.xlu1 %636 }
 0x113   : > { %v2632_v32 = vpop.permute.xlu0 %489 }
 0x118   : > { %788 = vrot.lane.b32.xlu2 %v2606_v25, %s2424_s11  ;;  %471 = vrot.lane.b32.xlu1 %v2630_v31, %s2426_s13 }
 0x119   : > { %1346 = vrot.lane.b32.xlu0 %v2580_v21, %s2431_s18 }
 0x11a   : > { %v2640_v33 = vpop.permute.xlu1 %928  ;;  %v2642_v34 = vpop.permute.xlu2 %467 }
 0x11b   : > { %v2646_v36 = vpop.permute.xlu0 %904 }
 0x120   : > { %1056 = vrot.lane.b32.xlu2 %v2630_v31, %s2427_s14  ;;  %618 = vrot.lane.b32.xlu1 %v2630_v31, %s2425_s12 }
 0x121   : > { %1516 = vrot.lane.b32.xlu0 %v2572_v20, %s2430_s17 }
 0x122   : > { %v2656_v38 = vpop.permute.xlu1 %1050  ;;  %v2658_v39 = vpop.permute.xlu2 %784 }
 0x123   : > { %v2660_v40 = vpop.permute.xlu0 %1220 }
 0x128   : > { %499 = vrot.lane.b32.xlu2 %v2664_v42, %s2426_s13  ;;  %764 = vrot.lane.b32.xlu1 %v2630_v31, %s2424_s11 }
 0x129   : > { %910 = vrot.lane.b32.xlu0 %v2630_v31, %s2428_s15 }
 0x12a   : > { %v2672_v43 = vpop.permute.xlu1 %1366  ;;  %v2674_v44 = vpop.permute.xlu2 %906 }
 0x12b   : > { %4751 = vst [vmem:[#allocation2_spill] sm:$0xff] %v2674_v44  ;;  %v2676_v45 = vpop.permute.xlu0 %1342 }
 0x130   : > { %934 = vrot.lane.b32.xlu1 %v2606_v25, %s2428_s15  ;;  %477 = vrot.lane.b32.xlu2 %v2678_v46, %s2426_s13 }
 0x131   : > { %1080 = vrot.lane.b32.xlu0 %v2606_v25, %s2427_s14 }
 0x132   : > { %v2686_v47 = vpop.permute.xlu1 %1488  ;;  %v2688_v48 = vpop.permute.xlu2 %1052 }
 0x133   : > { %4752 = vst [vmem:[#allocation3_spill] sm:$0xff] %v2688_v48  ;;  %v2690_v49 = vpop.permute.xlu0 %491 }
 0x138   : > { %475 = vrot.lane.b32.xlu1 %v2662_v41, %s2426_s13  ;;  %648 = vrot.lane.b32.xlu2 %v2692_v50, %s2425_s12 }
 0x139   : > { %501 = vrot.lane.b32.xlu0 %v2692_v50, %s2426_s13 }
 0x13a   : > { %v2700_v51 = vpop.permute.xlu1 %638  ;;  %v2702_v52 = vpop.permute.xlu2 %1368 }
 0x13b   : > { %4753 = vst [vmem:[#allocation4_spill] sm:$0xff] %v2702_v52  ;;  %v2704_v53 = vpop.permute.xlu0 %614  ;;  %v2177_v52 = vld [vmem:[%s4706_s2 + $0x128] sm:$0xff] }
 0x140   : > { %624 = vrot.lane.b32.xlu1 %v2678_v46, %s2425_s12  ;;  %479 = vrot.lane.b32.xlu2 %v2706_v54, %s2426_s13 }
 0x141   : > { %770 = vrot.lane.b32.xlu0 %v2678_v46, %s2424_s11 }
 0x142   : > { %v2714_v55 = vpop.permute.xlu1 %760  ;;  %v2716_v56 = vpop.permute.xlu2 %1490 }
 0x143   : > { %4754 = vst [vmem:[#allocation5_spill] sm:$0xff] %v2716_v56  ;;  %v2718_v57 = vpop.permute.xlu0 %930  ;;  %v2152_v56 = vld [vmem:[%s4706_s2 + $0x360] sm:$0xff] }
 0x144   : > { %4755 = vst [vmem:[#allocation6_spill] sm:$0xff] %v2718_v57  ;;  %v554_v57 = vld [vmem:[%s4706_s2 + $0x70] sm:$0xff] }
 0x148   : > { %794 = vrot.lane.b32.xlu1 %v2692_v50, %s2424_s11  ;;  %626 = vrot.lane.b32.xlu2 %v2706_v54, %s2425_s12 }
 0x149   : > { %503 = vrot.lane.b32.xlu0 %v2720_v58, %s2426_s13 }
 0x14a   : > { %v2728_v59 = vpop.permute.xlu1 %1222  ;;  %v2730_v60 = vpop.permute.xlu2 %640 }
 0x14b   : > { %4756 = vst [vmem:[#allocation7_spill] sm:$0xff] %v2728_v59  ;;  %v2732_v61 = vpop.permute.xlu0 %1076 }
 0x14c   : > { %4757 = vst [vmem:[#allocation8_spill] sm:$0xff] %v2730_v60 }
 0x14d   : > { %4758 = vst [vmem:[#allocation9_spill] sm:$0xff] %v2732_v61 }
 0x150   : > { %772 = vrot.lane.b32.xlu1 %v2706_v54, %s2424_s11  ;;  %796 = vrot.lane.b32.xlu2 %v2720_v58, %s2424_s11 }
 0x151   : > { %650 = vrot.lane.b32.xlu0 %v2720_v58, %s2425_s12 }
 0x152   : > { %v2740_v62 = vpop.permute.xlu1 %1344  ;;  %v2742_v63 = vpop.permute.xlu2 %762 }
 0x153   : > { %4759 = vst [vmem:[#allocation10_spill] sm:$0xff] %v2740_v62  ;;  %v2744_v0 = vpop.permute.xlu0 %1198  ;;  %v2176_v62 = vld [vmem:[%s4706_s2 + $0x120] sm:$0xff] }
 0x154   : > { %4760 = vst [vmem:[#allocation11_spill] sm:$0xff] %v2742_v63  ;;  %v513_v63 = vlaneseq }
 0x155   : > { %4761 = vst [vmem:[#allocation12_spill] sm:$0xff] %v2744_v0  ;;  %v453_v0 = vmul.f32 %v2152_v56, %v2678_v46  ;;  %v2201_v56 = vld [vmem:[%s4706_s2 + $0x1e8] sm:$0xff] }
 0x158   : > { %942 = vrot.lane.b32.xlu1 %v2720_v58, %s2428_s15  ;;  %1064 = vrot.lane.b32.xlu2 %v2706_v54, %s2427_s14 }
 0x159   : > { %918 = vrot.lane.b32.xlu0 %v2706_v54, %s2428_s15 }
 0x15a   : > { %v2752_v1 = vpop.permute.xlu1 %493  ;;  %v2754_v2 = vpop.permute.xlu2 %1492 }
 0x15b   : > { %4762 = vst [vmem:[#allocation13_spill] sm:$0xff] %v2752_v1  ;;  %v2756_v3 = vpop.permute.xlu0 %1514 }
 0x15c   : > { %4763 = vst [vmem:[#allocation14_spill] sm:$0xff] %v2754_v2 }
 0x15d   : > { %4764 = vst [vmem:[#allocation15_spill] sm:$0xff] %v2756_v3  ;;  %v2153_v3 = vld [vmem:[%s4706_s2 + $0x368] sm:$0xff] }
 0x15e   : > { %v454_v59 = vmul.f32 %v2153_v3, %v2692_v50 }
 0x160   : > { %1202 = vrot.lane.b32.xlu1 %v2630_v31, %s2429_s16  ;;  %1226 = vrot.lane.b32.xlu2 %v2606_v25, %s2429_s16 }
 0x161   : > { %1088 = vrot.lane.b32.xlu0 %v2720_v58, %s2427_s14 }
 0x162   : > { %v2764_v4 = vpop.permute.xlu2 %495  ;;  %v2766_v5 = vpop.permute.xlu1 %616 }
 0x163   : > { %4765 = vst [vmem:[#allocation16_spill] sm:$0xff] %v2764_v4  ;;  %v2768_v6 = vpop.permute.xlu0 %469 }
 0x164   : > { %4766 = vst [vmem:[#allocation17_spill] sm:$0xff] %v2766_v5 }
 0x165   : > { %4767 = vst [vmem:[#allocation18_spill] sm:$0xff] %v2768_v6 }
 0x168   : > { %646 = vrot.lane.b32.xlu1 %v2664_v42, %s2425_s12  ;;  %916 = vrot.lane.b32.xlu2 %v2678_v46, %s2428_s15 }
 0x169   : > { %622 = vrot.lane.b32.xlu0 %v2662_v41, %s2425_s12 }
 0x16a   : > { %v2776_v7 = vpop.permute.xlu2 %642  ;;  %v2778_v8 = vpop.permute.xlu1 %932 }
 0x16b   : > { %4768 = vst [vmem:[#allocation19_spill] sm:$0xff] %v2776_v7  ;;  %v2780_v9 = vpop.permute.xlu0 %786 }
 0x16c   : > { %4769 = vst [vmem:[#allocation20_spill] sm:$0xff] %v2778_v8 }
 0x16d   : > { %4770 = vst [vmem:[#allocation21_spill] sm:$0xff] %v2780_v9 }
 0x170   : > { %1210 = vrot.lane.b32.xlu1 %v2706_v54, %s2429_s16  ;;  %1234 = vrot.lane.b32.xlu2 %v2720_v58, %s2429_s16 }
 0x171   : > { %940 = vrot.lane.b32.xlu0 %v2692_v50, %s2428_s15 }
 0x172   : > { %v2788_v10 = vpop.permute.xlu2 %788  ;;  %v2790_v11 = vpop.permute.xlu1 %1078 }
 0x173   : > { %4771 = vst [vmem:[#allocation22_spill] sm:$0xff] %v2788_v10  ;;  %v2792_v12 = vpop.permute.xlu0 %908 }
 0x174   : > { %4772 = vst [vmem:[#allocation23_spill] sm:$0xff] %v2790_v11 }
 0x175   : > { %4773 = vst [vmem:[#allocation24_spill] sm:$0xff] %v2792_v12 }
 0x178   : > { %1372 = vrot.lane.b32.xlu1 %v2606_v25, %s2431_s18  ;;  %473 = vrot.lane.b32.xlu2 %v2644_v35, %s2426_s13 }
 0x179   : > { %1348 = vrot.lane.b32.xlu0 %v2630_v31, %s2431_s18 }
 0x17a   : > { %v2800_v13 = vpop.permute.xlu1 %1224  ;;  %v2802_v14 = vpop.permute.xlu2 %1056 }
 0x17b   : > { %4774 = vst [vmem:[#allocation25_spill] sm:$0xff] %v2800_v13  ;;  %v2804_v15 = vpop.permute.xlu0 %1054 }
 0x17c   : > { %4775 = vst [vmem:[#allocation26_spill] sm:$0xff] %v2802_v14 }
 0x17d   : > { %4776 = vst [vmem:[#allocation27_spill] sm:$0xff] %v2804_v15 }
 0x180   : > { %768 = vrot.lane.b32.xlu1 %v2662_v41, %s2424_s11  ;;  %792 = vrot.lane.b32.xlu2 %v2664_v42, %s2424_s11 }
 0x181   : > { %497 = vrot.lane.b32.xlu0 %v2648_v37, %s2426_s13 }
 0x182   : > { %v2812_v2 = vpop.permute.xlu1 %1370  ;;  %v2814_v11 = vpop.permute.xlu2 %499 }
 0x183   : > { %4777 = vst [vmem:[#allocation28_spill] sm:$0xff] %v2812_v2  ;;  %v2816_v10 = vpop.permute.xlu0 %1200 }
 0x184   : > { %4778 = vst [vmem:[#allocation29_spill] sm:$0xff] %v2814_v11 }
 0x185   : > { %4779 = vst [vmem:[#allocation30_spill] sm:$0xff] %v2816_v10 }
 0x188   : > { %1086 = vrot.lane.b32.xlu1 %v2692_v50, %s2427_s14  ;;  %1356 = vrot.lane.b32.xlu2 %v2706_v54, %s2431_s18 }
 0x189   : > { %1062 = vrot.lane.b32.xlu0 %v2678_v46, %s2427_s14 }
 0x18a   : > { %v2824_v14 = vpop.permute.xlu1 %471  ;;  %v478_v13 = vpop.permute.xlu2 %477 }
 0x18b   : > { %4780 = vst [vmem:[#allocation31_spill] sm:$0xff] %v2824_v14  ;;  %v2826_v15 = vpop.permute.xlu0 %1346 }
 0x18c   : > { %4781 = vst [vmem:[#allocation32_spill] sm:$0xff] %v2826_v15 }
 0x190   : > { %1494 = vrot.lane.b32.xlu1 %v2630_v31, %s2430_s17  ;;  %1518 = vrot.lane.b32.xlu2 %v2606_v25, %s2430_s17 }
 0x191   : > { %1380 = vrot.lane.b32.xlu0 %v2720_v58, %s2431_s18 }
 0x192   : > { %v2834_v2 = vpop.permute.xlu1 %618  ;;  %v649_v10 = vpop.permute.xlu2 %648 }
 0x193   : > { %4782 = vst [vmem:[#allocation33_spill] sm:$0xff] %v2834_v2  ;;  %v2836_v7 = vpop.permute.xlu0 %1516 }
 0x194   : > { %4783 = vst [vmem:[#allocation34_spill] sm:$0xff] %v2836_v7 }
 0x198   : > { %644 = vrot.lane.b32.xlu1 %v2648_v37, %s2425_s12  ;;  %914 = vrot.lane.b32.xlu2 %v2662_v41, %s2428_s15 }
 0x199   : > { %620 = vrot.lane.b32.xlu0 %v2644_v35, %s2425_s12 }
 0x19a   : > { %v2844_v15 = vpop.permute.xlu1 %764  ;;  %v480_v14 = vpop.permute.xlu2 %479 }
 0x19b   : > { %4784 = vst [vmem:[#allocation35_spill] sm:$0xff] %v2844_v15  ;;  %v2846_v4 = vpop.permute.xlu0 %910 }
 0x19c   : > { %4785 = vst [vmem:[#allocation36_spill] sm:$0xff] %v2846_v4 }
 0x1a0   : > { %1208 = vrot.lane.b32.xlu1 %v2678_v46, %s2429_s16  ;;  %1232 = vrot.lane.b32.xlu2 %v2692_v50, %s2429_s16 }
 0x1a1   : > { %938 = vrot.lane.b32.xlu0 %v2664_v42, %s2428_s15 }
 0x1a2   : > { %v2854_v7 = vpop.permute.xlu1 %934  ;;  %v2856_v2 = vpop.permute.xlu2 %626 }
 0x1a3   : > { %4786 = vst [vmem:[#allocation37_spill] sm:$0xff] %v2854_v7  ;;  %v2858_v8 = vpop.permute.xlu0 %1080  ;;  %v2870_v7 = vand.u32 127, %v513_v63  ;;  %v553_v63 = vld [vmem:[%s4706_s2 + $0x68] sm:$0xff] }
 0x1a4   : > { %4787 = vst [vmem:[#allocation38_spill] sm:$0xff] %v2858_v8 }
 0x1a5   : > { %vm515_vm1 = vcmp.lt.s32.totalorder %v2870_v7, 17  ;;  %vm660_vm2 = vcmp.lt.s32.totalorder %v2870_v7, 16  ;;  %vm806_vm3 = vcmp.lt.s32.totalorder %v2870_v7, 15  ;;  %vm952_vm4 = vcmp.lt.s32.totalorder %v2870_v7, 1 }
 0x1a6   : > { %vm1098_vm5 = vcmp.lt.s32.totalorder %v2870_v7, 127  ;;  %vm1244_vm6 = vcmp.lt.s32.totalorder %v2870_v7, 113  ;;  %vm1390_vm7 = vcmp.lt.s32.totalorder %v2870_v7, 112  ;;  %vm1536_vm8 = vcmp.lt.s32.totalorder %v2870_v7, 111 }
 0x1a8   : > { %1526 = vrot.lane.b32.xlu1 %v2720_v58, %s2430_s17  ;;  %766 = vrot.lane.b32.xlu2 %v2644_v35, %s2424_s11 }
 0x1a9   : > { %1502 = vrot.lane.b32.xlu0 %v2706_v54, %s2430_s17 }
 0x1aa   : > { %v2866_v4 = vpop.permute.xlu1 %475  ;;  %v2868_v15 = vpop.permute.xlu2 %796 }
 0x1ab   : > { %4788 = vst [vmem:[#allocation39_spill] sm:$0xff] %v2866_v4  ;;  %v502_v12 = vpop.permute.xlu0 %501  ;;  %v552_v4 = vld [vmem:[%s4706_s2 + $0x60] sm:$0xff] }
 0x1ac   : > { %v522_v11 = vsel %vm515_vm1, %v478_v13, %v502_v12  ;;  %v534_v5 = vsel %vm515_vm1, %v502_v12, %v478_v13 }
 0x1ad   : > { %v576_v6 = vmul.f32 %v552_v4, %v534_v5  ;;  %v577_v1 = vmul.f32 %v553_v63, %v522_v11  ;;  %v2200_v4 = vld [vmem:[%s4706_s2 + $0x1e0] sm:$0xff] }
 0x1b0   : > { %1060 = vrot.lane.b32.xlu1 %v2662_v41, %s2427_s14  ;;  %1084 = vrot.lane.b32.xlu2 %v2664_v42, %s2427_s14 }
 0x1b1   : > { %790 = vrot.lane.b32.xlu0 %v2648_v37, %s2424_s11 }
 0x1b2   : > { %v625_v8 = vpop.permute.xlu1 %624  ;;  %v2879_v9 = vpop.permute.xlu2 %1064 }
 0x1b3   : > { %v771_v60 = vpop.permute.xlu0 %770  ;;  %v667_v12 = vsel %vm660_vm2, %v625_v8, %v649_v10  ;;  %v679_v13 = vsel %vm660_vm2, %v649_v10, %v625_v8 }
 0x1b4   : > { %v722_v48 = vmul.f32 %v2176_v62, %v679_v13  ;;  %v723_v61 = vmul.f32 %v2177_v52, %v667_v12  ;;  %v600_v52 = vadd.f32 %v576_v6, %v453_v0  ;;  %v601_v62 = vadd.f32 %v577_v1, %v454_v59  ;;  %v555_v59 = vld [vmem:[%s4706_s2 + $0x78] sm:$0xff] }
 0x1b6   : > { %v746_v63 = vadd.f32 %v722_v48, %v600_v52  ;;  %v747_v12 = vadd.f32 %v723_v61, %v601_v62  ;;  %v2155_v61 = vld [vmem:[%s4706_s2 + $0x378] sm:$0xff]  ;;  %v2178_v52 = vld [vmem:[%s4706_s2 + $0x130] sm:$0xff] }
 0x1b7   : > { %v2179_v62 = vld [vmem:[%s4706_s2 + $0x138] sm:$0xff] }
 0x1b8   : > { %1378 = vrot.lane.b32.xlu1 %v2692_v50, %s2431_s18  ;;  %912 = vrot.lane.b32.xlu2 %v2644_v35, %s2428_s15 }
 0x1b9   : > { %1354 = vrot.lane.b32.xlu0 %v2678_v46, %s2431_s18 }
 0x1ba   : > { %v795_v3 = vpop.permute.xlu1 %794  ;;  %v2923_v5 = vpop.permute.xlu2 %1226 }
 0x1bb   : > { %4789 = vst [vmem:[#allocation40_spill] sm:$0xff] %v2923_v5  ;;  %v504_v8 = vpop.permute.xlu0 %503  ;;  %v813_v10 = vsel %vm806_vm3, %v771_v60, %v795_v3  ;;  %v825_v11 = vsel %vm806_vm3, %v795_v3, %v771_v60  ;;  %v2154_v60 = vld [vmem:[%s4706_s2 + $0x370] sm:$0xff] }
 0x1bc   : > { %v868_v13 = vmul.f32 %v2200_v4, %v825_v11  ;;  %v869_v44 = vmul.f32 %v2201_v56, %v813_v10  ;;  %v523_v0 = vsel %vm515_vm1, %v480_v14, %v504_v8  ;;  %v535_v1 = vsel %vm515_vm1, %v504_v8, %v480_v14  ;;  %v540_v8 = vld [vmem:[%s4706_s2] sm:$0xff]  ;;  %v541_v10 = vld [vmem:[%s4706_s2 + $0x8] sm:$0xff] }
 0x1bd   : > { %v578_v4 = vmul.f32 %v554_v57, %v535_v1  ;;  %v579_v14 = vmul.f32 %v555_v59, %v523_v0  ;;  %v455_v56 = vmul.f32 %v2154_v60, %v2706_v54  ;;  %v528_v54 = vsel %vm515_vm1, %v2632_v32, %v2618_v28 }
 0x1be   : > { %v2939_v6 = vadd.f32 %v868_v13, %v746_v63  ;;  %v2941_v48 = vadd.f32 %v869_v44, %v747_v12  ;;  %v516_v44 = vsel %vm515_vm1, %v2618_v28, %v2632_v32  ;;  %v456_v11 = vmul.f32 %v2155_v61, %v2720_v58  ;;  %v2202_v28 = vld [vmem:[%s4706_s2 + $0x1f0] sm:$0xff]  ;;  %v2203_v32 = vld [vmem:[%s4706_s2 + $0x1f8] sm:$0xff]  ;;  %v2140_v61 = vld [vmem:[%s4706_s2 + $0x300] sm:$0xff] }
 0x1bf   : > { %v602_v58 = vadd.f32 %v578_v4, %v455_v56  ;;  %v2164_v4 = vld [vmem:[%s4706_s2 + $0xc0] sm:$0xff]  ;;  %v441_v56 = vmul.f32 %v2140_v61, %v2504_v16  ;;  %v2226_v16 = vld [vmem:[%s4706_s2 + $0x2b0] sm:$0xff]  ;;  %v2145_v61 = vld [vmem:[%s4706_s2 + $0x328] sm:$0xff] }
 0x1c0   : > { %4790 = vst [vmem:[#allocation41_spill] sm:$0xff] %v2939_v6  ;;  %1206 = vrot.lane.b32.xlu1 %v2662_v41, %s2429_s16  ;;  %1230 = vrot.lane.b32.xlu2 %v2664_v42, %s2429_s16  ;;  %v603_v1 = vadd.f32 %v579_v14, %v456_v11 }
 0x1c1   : > { %4791 = vst [vmem:[#allocation42_spill] sm:$0xff] %v2941_v48  ;;  %936 = vrot.lane.b32.xlu0 %v2648_v37, %s2428_s15 }
 0x1c2   : > { %v773_v57 = vpop.permute.xlu1 %772  ;;  %v2966_v3 = vpop.permute.xlu2 %916 }
 0x1c3   : > { %4792 = vst [vmem:[#allocation43_spill] sm:$0xff] %v2966_v3  ;;  %v651_v63 = vpop.permute.xlu0 %650  ;;  %v814_v12 = vsel %vm806_vm3, %v773_v57, %v2868_v15  ;;  %v826_v13 = vsel %vm806_vm3, %v2868_v15, %v773_v57  ;;  %v564_v57 = vmul.f32 %v540_v8, %v528_v54  ;;  %v2142_v8 = vld [vmem:[%s4706_s2 + $0x310] sm:$0xff] }
 0x1c4   : > { %v668_v59 = vsel %vm660_vm2, %v2856_v2, %v651_v63  ;;  %v680_v0 = vsel %vm660_vm2, %v651_v63, %v2856_v2  ;;  %v2141_v2 = vld [vmem:[%s4706_s2 + $0x308] sm:$0xff]  ;;  %v565_v63 = vmul.f32 %v541_v10, %v516_v44  ;;  %v870_v6 = vmul.f32 %v2202_v28, %v826_v13 }
 0x1c5   : > { %v724_v60 = vmul.f32 %v2178_v52, %v680_v0  ;;  %v725_v15 = vmul.f32 %v2179_v62, %v668_v59  ;;  %v871_v3 = vmul.f32 %v2203_v32, %v814_v12  ;;  %v442_v14 = vmul.f32 %v2141_v2, %v2512_v17  ;;  %v2188_v12 = vld [vmem:[%s4706_s2 + $0x180] sm:$0xff]  ;;  %v2189_v13 = vld [vmem:[%s4706_s2 + $0x188] sm:$0xff] }
 0x1c6   : > { %v661_v62 = vsel %vm660_vm2, %v2616_v27, %v2628_v30  ;;  %v673_v17 = vsel %vm660_vm2, %v2628_v30, %v2616_v27  ;;  %v807_v30 = vsel %vm806_vm3, %v2588_v22, %v2596_v23  ;;  %v819_v10 = vsel %vm806_vm3, %v2596_v23, %v2588_v22  ;;  %v2143_v22 = vld [vmem:[%s4706_s2 + $0x318] sm:$0xff]  ;;  %v2212_v32 = vld [vmem:[%s4706_s2 + $0x240] sm:$0xff] }
 0x1c7   : > { %v748_v5 = vadd.f32 %v724_v60, %v602_v58  ;;  %v749_v48 = vadd.f32 %v725_v15, %v603_v1  ;;  %v710_v59 = vmul.f32 %v2164_v4, %v673_v17  ;;  %v2213_v58 = vld [vmem:[%s4706_s2 + $0x248] sm:$0xff]  ;;  %v953_v1 = vsel %vm952_vm4, %v2646_v36, %v2640_v33  ;;  %v2146_v4 = vld [vmem:[%s4706_s2 + $0x330] sm:$0xff] }
 0x1c8   : > { %1524 = vrot.lane.b32.xlu1 %v2692_v50, %s2430_s17  ;;  %1058 = vrot.lane.b32.xlu2 %v2644_v35, %s2427_s14  ;;  %v2165_v50 = vld [vmem:[%s4706_s2 + $0xc8] sm:$0xff]  ;;  %v965_v60 = vsel %vm952_vm4, %v2640_v33, %v2646_v36  ;;  %v3074_v15 = vmul.f32 %v2142_v8, %v2538_v18  ;;  %v2147_v33 = vld [vmem:[%s4706_s2 + $0x338] sm:$0xff]  ;;  %v1003_v17 = vmul.f32 %v2213_v58, %v953_v1 }
 0x1c9   : > { %v894_v52 = vadd.f32 %v870_v6, %v748_v5  ;;  %v895_v44 = vadd.f32 %v871_v3, %v749_v48  ;;  %1500 = vrot.lane.b32.xlu0 %v2678_v46, %s2430_s17  ;;  %v2227_v46 = vld [vmem:[%s4706_s2 + $0x2b8] sm:$0xff]  ;;  %v588_v48 = vadd.f32 %v564_v57, %v441_v56  ;;  %v589_v3 = vadd.f32 %v565_v63, %v442_v14  ;;  %v2144_v63 = vld [vmem:[%s4706_s2 + $0x320] sm:$0xff] }
 0x1ca   : > { %v943_v5 = vpop.permute.xlu1 %942  ;;  %v3031_v6 = vpop.permute.xlu2 %1234  ;;  %v711_v0 = vmul.f32 %v2165_v50, %v661_v62  ;;  %v856_v14 = vmul.f32 %v2188_v12, %v819_v10  ;;  %v857_v56 = vmul.f32 %v2189_v13, %v807_v30  ;;  %v3089_v50 = vmul.f32 %v2143_v22, %v2540_v19 }
 0x1cb   : > { %v919_v27 = vpop.permute.xlu0 %918  ;;  %v734_v2 = vadd.f32 %v710_v59, %v588_v48  ;;  %v1002_v62 = vmul.f32 %v2212_v32, %v965_v60  ;;  %v3106_v19 = vmul.f32 %v2145_v61, %v2572_v20  ;;  %v2250_v48 = vld [vmem:[%s4706_s2 + $0x430] sm:$0xff]  ;;  %v517_v58 = vsel %vm515_vm1, %v2642_v34, %v2690_v49 }
 0x1cc   : > { %v960_v54 = vsel %vm952_vm4, %v919_v27, %v943_v5  ;;  %v972_v11 = vsel %vm952_vm4, %v943_v5, %v919_v27  ;;  %v735_v57 = vadd.f32 %v711_v0, %v589_v3  ;;  %v3115_v5 = vmul.f32 %v2146_v4, %v2630_v31  ;;  %v2251_v3 = vld [vmem:[%s4706_s2 + $0x438] sm:$0xff]  ;;  %v542_v32 = vld [vmem:[%s4706_s2 + $0x10] sm:$0xff] }
 0x1cd   : > { %v1016_v23 = vmul.f32 %v2226_v16, %v972_v11  ;;  %v1017_v28 = vmul.f32 %v2227_v46, %v960_v54  ;;  %v2236_v16 = vld [vmem:[%s4706_s2 + $0x3c0] sm:$0xff]  ;;  %v3112_v46 = vmul.f32 %v2147_v33, %v2606_v25  ;;  %v880_v27 = vadd.f32 %v856_v14, %v734_v2 }
 0x1ce   : > { %v881_v20 = vadd.f32 %v857_v56, %v735_v57  ;;  %v1111_v25 = vsel %vm1098_vm5, %v2604_v24, %v2656_v38  ;;  %v2260_v54 = vld [vmem:[%s4706_s2 + $0x480] sm:$0xff]  ;;  %v1245_v11 = vsel %vm1244_vm6, %v2614_v26, %v2660_v40  ;;  %v529_v1 = vsel %vm515_vm1, %v2690_v49, %v2642_v34  ;;  %v2166_v34 = vld [vmem:[%s4706_s2 + $0xd0] sm:$0xff]  ;;  %v2167_v49 = vld [vmem:[%s4706_s2 + $0xd8] sm:$0xff] }
 0x1cf   : > { %v1040_v18 = vadd.f32 %v1016_v23, %v894_v52  ;;  %v1041_v36 = vadd.f32 %v1017_v28, %v895_v44  ;;  %v1099_v52 = vsel %vm1098_vm5, %v2656_v38, %v2604_v24  ;;  %v3109_v44 = vmul.f32 %v2144_v63, %v2580_v21  ;;  %v2237_v21 = vld [vmem:[%s4706_s2 + $0x3c8] sm:$0xff] }
 0x1d0   : > { %1352 = vrot.lane.b32.xlu1 %v2662_v41, %s2431_s18  ;;  %1376 = vrot.lane.b32.xlu2 %v2664_v42, %s2431_s18  ;;  %v1148_v10 = vmul.f32 %v2236_v16, %v1099_v52  ;;  %v1026_v38 = vadd.f32 %v1002_v62, %v880_v27  ;;  %v1027_v13 = vadd.f32 %v1003_v17, %v881_v20  ;;  %v2261_v23 = vld [vmem:[%s4706_s2 + $0x488] sm:$0xff]  ;;  %v2190_v62 = vld [vmem:[%s4706_s2 + $0x190] sm:$0xff] }
 0x1d1   : > { %1082 = vrot.lane.b32.xlu0 %v2648_v37, %s2427_s14  ;;  %v1149_v22 = vmul.f32 %v2237_v21, %v1111_v25  ;;  %v1257_v28 = vsel %vm1244_vm6, %v2660_v40, %v2614_v26  ;;  %v1294_v60 = vmul.f32 %v2260_v54, %v1245_v11  ;;  %v2284_v26 = vld [vmem:[%s4706_s2 + $0x540] sm:$0xff]  ;;  %v1391_v40 = vsel %vm1390_vm7, %v2676_v45, %v2672_v43  ;;  %v2191_v17 = vld [vmem:[%s4706_s2 + $0x198] sm:$0xff] }
 0x1d2   : > { %v3123_v8 = vpop.permute.xlu1 %1202  ;;  %v3133_v30 = vpop.permute.xlu2 %473  ;;  %v1172_v57 = vadd.f32 %v1148_v10, %v1026_v38  ;;  %v662_v63 = vsel %vm660_vm2, %v2704_v53, %v2700_v51  ;;  %v674_v4 = vsel %vm660_vm2, %v2700_v51, %v2704_v53  ;;  %v1295_v33 = vmul.f32 %v2261_v23, %v1257_v28  ;;  %v2308_v52 = vld [vmem:[%s4706_s2 + $0x600] sm:$0xff]  ;;  %v2215_v28 = vld [vmem:[%s4706_s2 + $0x258] sm:$0xff] }
 0x1d3   : > { %v1089_v31 = vpop.permute.xlu0 %1088  ;;  %v566_v14 = vmul.f32 %v542_v32, %v529_v1  ;;  %v1173_v51 = vadd.f32 %v1149_v22, %v1027_v13  ;;  %v1440_v53 = vmul.f32 %v2284_v26, %v1391_v40  ;;  %v1549_v20 = vsel %vm1536_vm8, %v2626_v29, %v2686_v47  ;;  %v2151_v22 = vld [vmem:[%s4706_s2 + $0x358] sm:$0xff]  ;;  %v4793_v32 = vld [vmem:[#allocation6_spill] sm:$0xff]  ;;  %v2238_v26 = vld [vmem:[%s4706_s2 + $0x3d0] sm:$0xff] }
 0x1d4   : > { %v1106_v12 = vsel %vm1098_vm5, %v2879_v9, %v1089_v31  ;;  %v1118_v24 = vsel %vm1098_vm5, %v1089_v31, %v2879_v9  ;;  %v543_v9 = vld [vmem:[%s4706_s2 + $0x18] sm:$0xff]  ;;  %v1318_v21 = vadd.f32 %v1294_v60, %v1172_v57 }
 0x1d5   : > { %v1162_v59 = vmul.f32 %v2250_v48, %v1106_v12  ;;  %v1163_v0 = vmul.f32 %v2251_v3, %v1118_v24  ;;  %v567_v56 = vmul.f32 %v543_v9, %v517_v58  ;;  %v2309_v48 = vld [vmem:[%s4706_s2 + $0x608] sm:$0xff]  ;;  %v1537_v3 = vsel %vm1536_vm8, %v2686_v47, %v2626_v29  ;;  %v4794_v9 = vld [vmem:[#allocation2_spill] sm:$0xff]  ;;  %v2239_v40 = vld [vmem:[%s4706_s2 + $0x3d8] sm:$0xff] }
 0x1d6   : > { %v590_v54 = vadd.f32 %v566_v14, %v3074_v15  ;;  %v1319_v47 = vadd.f32 %v1295_v33, %v1173_v51  ;;  %v1464_v38 = vadd.f32 %v1440_v53, %v1318_v21  ;;  %v1586_v13 = vmul.f32 %v2308_v52, %v1537_v3  ;;  %v4795_v57 = vld [vmem:[#allocation9_spill] sm:$0xff]  ;;  %v2224_v51 = vld [vmem:[%s4706_s2 + $0x2a0] sm:$0xff]  ;;  %v2225_v53 = vld [vmem:[%s4706_s2 + $0x2a8] sm:$0xff] }
 0x1d7   : > { %v3176_v61 = vadd.f32 %v1162_v59, %v1040_v18  ;;  %v3178_v2 = vadd.f32 %v1163_v0, %v1041_v36  ;;  %v2285_v18 = vld [vmem:[%s4706_s2 + $0x548] sm:$0xff]  ;;  %v1403_v36 = vsel %vm1390_vm7, %v2672_v43, %v2676_v45  ;;  %v808_v43 = vsel %vm806_vm3, %v2714_v55, %v2658_v39  ;;  %v2150_v0 = vld [vmem:[%s4706_s2 + $0x350] sm:$0xff]  ;;  %v4799_v21 = vld [vmem:[#allocation13_spill] sm:$0xff] }
 0x1d8   : > { %1228 = vrot.lane.b32.xlu1 %v2648_v37, %s2429_s16  ;;  %1498 = vrot.lane.b32.xlu2 %v2662_v41, %s2430_s17  ;;  %v820_v45 = vsel %vm806_vm3, %v2658_v39, %v2714_v55  ;;  %v712_v39 = vmul.f32 %v2166_v34, %v674_v4  ;;  %v713_v55 = vmul.f32 %v2167_v49, %v662_v63  ;;  %v4796_v34 = vld [vmem:[#allocation3_spill] sm:$0xff] }
 0x1d9   : > { %1204 = vrot.lane.b32.xlu0 %v2644_v35, %s2429_s16  ;;  %v1441_v25 = vmul.f32 %v2285_v18, %v1403_v36  ;;  %v591_v11 = vadd.f32 %v567_v56, %v3089_v50  ;;  %v858_v12 = vmul.f32 %v2190_v62, %v820_v45  ;;  %v859_v24 = vmul.f32 %v2191_v17, %v808_v43  ;;  %v2214_v50 = vld [vmem:[%s4706_s2 + $0x250] sm:$0xff]  ;;  %v4797_v52 = vld [vmem:[#allocation7_spill] sm:$0xff] }
 0x1da   : > { %v647_v16 = vpop.permute.xlu1 %646  ;;  %v3246_v29 = vpop.permute.xlu2 %792  ;;  %v1587_v59 = vmul.f32 %v2309_v48, %v1549_v20  ;;  %v736_v23 = vadd.f32 %v712_v39, %v590_v54  ;;  %v954_v58 = vsel %vm952_vm4, %v4794_v9, %v4793_v32  ;;  %v966_v1 = vsel %vm952_vm4, %v4793_v32, %v4794_v9  ;;  %v4798_v48 = vld [vmem:[#allocation12_spill] sm:$0xff] }
 0x1db   : > { %v623_v27 = vpop.permute.xlu0 %622  ;;  %v737_v15 = vadd.f32 %v713_v55, %v591_v11  ;;  %v1465_v60 = vadd.f32 %v1441_v25, %v1319_v47  ;;  %v1100_v49 = vsel %vm1098_vm5, %v4796_v34, %v4795_v57  ;;  %v1112_v63 = vsel %vm1098_vm5, %v4795_v57, %v4796_v34  ;;  %v544_v55 = vld [vmem:[%s4706_s2 + $0x20] sm:$0xff] }
 0x1dc   : > { %v3238_v31 = vsel %vm660_vm2, %v623_v27, %v647_v16  ;;  %v3242_v10 = vsel %vm660_vm2, %v647_v16, %v623_v27  ;;  %v882_v4 = vadd.f32 %v858_v12, %v736_v23  ;;  %v3287_v18 = vmul.f32 %v2151_v22, %v2664_v42  ;;  %v2263_v16 = vld [vmem:[%s4706_s2 + $0x498] sm:$0xff]  ;;  %v545_v27 = vld [vmem:[%s4706_s2 + $0x28] sm:$0xff]  ;;  %v4800_v25 = vld [vmem:[#allocation18_spill] sm:$0xff] }
 0x1dd   : > { %v883_v33 = vadd.f32 %v859_v24, %v737_v15  ;;  %v3290_v36 = vmul.f32 %v2150_v0, %v2662_v41  ;;  %v1004_v14 = vmul.f32 %v2214_v50, %v966_v1  ;;  %v1005_v56 = vmul.f32 %v2215_v28, %v954_v58  ;;  %v4801_v12 = vld [vmem:[#allocation43_spill] sm:$0xff]  ;;  %v2286_v22 = vld [vmem:[%s4706_s2 + $0x550] sm:$0xff]  ;;  %v4803_v15 = vld [vmem:[#allocation10_spill] sm:$0xff] }
 0x1de   : > { %v3302_v17 = vadd.f32 %v1586_v13, %v1464_v38  ;;  %v3304_v43 = vadd.f32 %v1587_v59, %v1465_v60  ;;  %v1150_v41 = vmul.f32 %v2238_v26, %v1100_v49  ;;  %v1151_v45 = vmul.f32 %v2239_v40, %v1112_v63  ;;  %v4802_v23 = vld [vmem:[#allocation4_spill] sm:$0xff]  ;;  %v2287_v58 = vld [vmem:[%s4706_s2 + $0x558] sm:$0xff]  ;;  %v4805_v57 = vld [vmem:[#allocation42_spill] sm:$0xff] }
 0x1df   : > { %v1246_v3 = vsel %vm1244_vm6, %v4798_v48, %v4797_v52  ;;  %v1258_v20 = vsel %vm1244_vm6, %v4797_v52, %v4798_v48  ;;  %v518_v54 = vsel %vm515_vm1, %v4800_v25, %v4799_v21  ;;  %v530_v11 = vsel %vm515_vm1, %v4799_v21, %v4800_v25  ;;  %v4804_v26 = vld [vmem:[#allocation41_spill] sm:$0xff]  ;;  %v4808_v52 = vld [vmem:[#allocation8_spill] sm:$0xff] }
 0x1e0   : > { %1350 = vrot.lane.b32.xlu1 %v2644_v35, %s2431_s18  ;;  %1374 = vrot.lane.b32.xlu2 %v2648_v37, %s2431_s18  ;;  %v1028_v38 = vadd.f32 %v1004_v14, %v882_v4  ;;  %v1029_v13 = vadd.f32 %v1005_v56, %v883_v33  ;;  %v1392_v50 = vsel %vm1390_vm7, %v4803_v15, %v4802_v23  ;;  %v4809_v48 = vld [vmem:[#allocation17_spill] sm:$0xff] }
 0x1e1   : > { %1522 = vrot.lane.b32.xlu0 %v2664_v42, %s2430_s17  ;;  %v2262_v42 = vld [vmem:[%s4706_s2 + $0x490] sm:$0xff]  ;;  %v1404_v28 = vsel %vm1390_vm7, %v4802_v23, %v4803_v15  ;;  %v1297_v9 = vmul.f32 %v2263_v16, %v1258_v20  ;;  %v568_v1 = vmul.f32 %v544_v55, %v530_v11  ;;  %v569_v60 = vmul.f32 %v545_v27, %v518_v54  ;;  %v2169_v16 = vld [vmem:[%s4706_s2 + $0xe8] sm:$0xff]  ;;  %v551_v21 = vld [vmem:[%s4706_s2 + $0x58] sm:$0xff] }
 0x1e2   : > { %v3300_v62 = vpop.permute.xlu1 %1210  ;;  %v1296_v32 = vmul.f32 %v2262_v42, %v1246_v3  ;;  %v3360_v49 = vpop.permute.xlu2 %1356  ;;  %v1174_v63 = vadd.f32 %v1150_v41, %v1028_v38  ;;  %v1175_v4 = vadd.f32 %v1151_v45, %v1029_v13  ;;  %v3366_v33 = vmul.f32 %v3302_v17, %v3302_v17  ;;  %v4807_v41 = vld [vmem:[#allocation5_spill] sm:$0xff]  ;;  %v2168_v42 = vld [vmem:[%s4706_s2 + $0xe0] sm:$0xff]  ;;  %v550_v27 = vld [vmem:[%s4706_s2 + $0x50] sm:$0xff] }
 0x1e3   : > { %v941_v39 = vpop.permute.xlu0 %940  ;;  %v3370_v14 = vmul.f32 %v3304_v43, %v3304_v43  ;;  %v3372_v56 = vmul.f32 %v2286_v22, %v1392_v50  ;;  %v663_v3 = vsel %vm660_vm2, %v4809_v48, %v4808_v52  ;;  %v675_v20 = vsel %vm660_vm2, %v4808_v52, %v4809_v48  ;;  %v4810_v25 = vld [vmem:[#allocation29_spill] sm:$0xff]  ;;  %v4811_v54 = vld [vmem:[#allocation39_spill] sm:$0xff]  ;;  %v4816_v52 = vld [vmem:[#allocation16_spill] sm:$0xff] }
 0x1e4   : > { %v959_v24 = vsel %vm952_vm4, %v4801_v12, %v941_v39  ;;  %v971_v47 = vsel %vm952_vm4, %v941_v39, %v4801_v12  ;;  %v3397_v39 = vmul.f32 %v2287_v58, %v1404_v28  ;;  %v3399_v55 = vadd.f32 %v1296_v32, %v1174_v63  ;;  %v2311_v38 = vld [vmem:[%s4706_s2 + $0x618] sm:$0xff]  ;;  %v4813_v32 = vld [vmem:[#allocation11_spill] sm:$0xff]  ;;  %v2174_v58 = vld [vmem:[%s4706_s2 + $0x110] sm:$0xff] }
 0x1e5   : > { %v1014_v59 = vmul.f32 %v2224_v51, %v971_v47  ;;  %v1015_v0 = vmul.f32 %v2225_v53, %v959_v24  ;;  %v2310_v51 = vld [vmem:[%s4706_s2 + $0x610] sm:$0xff]  ;;  %v4806_v53 = vld [vmem:[#allocation15_spill] sm:$0xff]  ;;  %v521_v11 = vsel %vm515_vm1, %v4811_v54, %v4810_v25  ;;  %v533_v12 = vsel %vm515_vm1, %v4810_v25, %v4811_v54  ;;  %v4812_v28 = vld [vmem:[#allocation21_spill] sm:$0xff] }
 0x1e6   : > { %v1538_v45 = vsel %vm1536_vm8, %v4807_v41, %v4806_v53  ;;  %v3417_v47 = vadd.f32 %v1297_v9, %v1175_v4  ;;  %v1550_v13 = vsel %vm1536_vm8, %v4806_v53, %v4807_v41  ;;  %v714_v15 = vmul.f32 %v2168_v42, %v675_v20  ;;  %v4814_v63 = vld [vmem:[#allocation24_spill] sm:$0xff]  ;;  %v4817_v48 = vld [vmem:[#allocation31_spill] sm:$0xff] }
 0x1e7   : > { %v3355_v40 = vadd.f32 %v1014_v59, %v4804_v26  ;;  %v3358_v34 = vadd.f32 %v1015_v0, %v4805_v57  ;;  %v592_v59 = vadd.f32 %v568_v1, %v3109_v44  ;;  %v593_v0 = vadd.f32 %v569_v60, %v3106_v19  ;;  %v2175_v44 = vld [vmem:[%s4706_s2 + $0x118] sm:$0xff]  ;;  %v2360_v19 = vld [vmem:[%s4705_s1 + $0x20] sm:$0xff]  ;;  %v2193_v60 = vld [vmem:[%s4706_s2 + $0x1a8] sm:$0xff] }
 0x1e8   : > { %1520 = vrot.lane.b32.xlu1 %v2648_v37, %s2430_s17  ;;  %v3430_v23 = vmul.f32 %v2310_v51, %v1538_v45  ;;  %v715_v50 = vmul.f32 %v2169_v16, %v663_v3  ;;  %v809_v9 = vsel %vm806_vm3, %v4813_v32, %v4812_v28  ;;  %v2192_v1 = vld [vmem:[%s4706_s2 + $0x1a0] sm:$0xff]  ;;  %v821_v26 = vsel %vm806_vm3, %v4812_v28, %v4813_v32  ;;  %v4815_v4 = vld [vmem:[#allocation20_spill] sm:$0xff]  ;;  %v547_v16 = vld [vmem:[%s4706_s2 + $0x38] sm:$0xff] }
 0x1e9   : > { %1496 = vrot.lane.b32.xlu0 %v2644_v35, %s2430_s17  ;;  %v2216_v57 = vld [vmem:[%s4706_s2 + $0x260] sm:$0xff]  ;;  %v967_v51 = vsel %vm952_vm4, %v4815_v4, %v4814_v63  ;;  %v574_v53 = vmul.f32 %v550_v27, %v533_v12  ;;  %v575_v41 = vmul.f32 %v551_v21, %v521_v11  ;;  %v3462_v45 = vmul.f32 %v2311_v38, %v1550_v13  ;;  %v546_v42 = vld [vmem:[%s4706_s2 + $0x30] sm:$0xff] }
 0x1ea   : > { %v3415_v24 = vpop.permute.xlu1 %1372  ;;  %v519_v3 = vsel %vm515_vm1, %v4817_v48, %v4816_v52  ;;  %v531_v20 = vsel %vm515_vm1, %v4816_v52, %v4817_v48  ;;  %2132 = vmatmul.msk.bf16.gmra.mxu0 %vm319_vm0, %v2360_v19  ;;  %2138 = vmatmul.msk.bf16.gmra.mxu1 %vm319_vm0, %v2360_v19  ;;  %v739_v27 = vadd.f32 %v715_v50, %v593_v0  ;;  %v3488_v0 = vpop.permute.xlu2 %1518  ;;  %v4819_v50 = vld [vmem:[#allocation33_spill] sm:$0xff] }
 0x1eb   : > { %v3428_v22 = vpop.permute.xlu0 %1348  ;;  %v738_v21 = vadd.f32 %v714_v15, %v592_v59  ;;  %v720_v25 = vmul.f32 %v2174_v58, %v3242_v10  ;;  %v721_v54 = vmul.f32 %v2175_v44, %v3238_v31  ;;  %v860_v11 = vmul.f32 %v2192_v1, %v821_v26  ;;  %v2198_v31 = vld [vmem:[%s4706_s2 + $0x1d0] sm:$0xff]  ;;  %v2199_v10 = vld [vmem:[%s4706_s2 + $0x1d8] sm:$0xff]  ;;  %v2217_v59 = vld [vmem:[%s4706_s2 + $0x268] sm:$0xff] }
 0x1ec   : > { %v861_v12 = vmul.f32 %v2193_v60, %v809_v9  ;;  %v955_v38 = vsel %vm952_vm4, %v4814_v63, %v4815_v4  ;;  %v1006_v13 = vmul.f32 %v2216_v57, %v967_v51  ;;  %v570_v28 = vmul.f32 %v546_v42, %v531_v20  ;;  %v4818_v15 = vld [vmem:[#allocation19_spill] sm:$0xff]  ;;  %v4820_v44 = vld [vmem:[#allocation22_spill] sm:$0xff]  ;;  %v2194_v42 = vld [vmem:[%s4706_s2 + $0x1b0] sm:$0xff] }
 0x1ed   : > { %v571_v32 = vmul.f32 %v547_v16, %v519_v3  ;;  %v598_v52 = vadd.f32 %v574_v53, %v3290_v36  ;;  %v599_v19 = vadd.f32 %v575_v41, %v3287_v18  ;;  %v2170_v36 = vld [vmem:[%s4706_s2 + $0xf0] sm:$0xff]  ;;  %v2171_v18 = vld [vmem:[%s4706_s2 + $0xf8] sm:$0xff]  ;;  %v664_v9 = vsel %vm660_vm2, %v4819_v50, %v4818_v15  ;;  %v4821_v1 = vld [vmem:[#allocation35_spill] sm:$0xff] }
 0x1ee   : > { %v676_v58 = vsel %vm660_vm2, %v4818_v15, %v4819_v50  ;;  %v810_v60 = vsel %vm806_vm3, %v4821_v1, %v4820_v44  ;;  %v822_v26 = vsel %vm806_vm3, %v4820_v44, %v4821_v1  ;;  %v2195_v16 = vld [vmem:[%s4706_s2 + $0x1b8] sm:$0xff]  ;;  %v717_v50 = vmul.f32 %v2171_v18, %v664_v9  ;;  %v2218_v44 = vld [vmem:[%s4706_s2 + $0x270] sm:$0xff] }
 0x1ef   : > { %v744_v63 = vadd.f32 %v720_v25, %v598_v52  ;;  %v745_v4 = vadd.f32 %v721_v54, %v599_v19  ;;  %v1007_v25 = vmul.f32 %v2217_v59, %v955_v38  ;;  %v4822_v54 = vld [vmem:[#allocation23_spill] sm:$0xff]  ;;  %v716_v15 = vmul.f32 %v2170_v36, %v676_v58  ;;  %v2219_v1 = vld [vmem:[%s4706_s2 + $0x278] sm:$0xff]  ;;  %v2240_v36 = vld [vmem:[%s4706_s2 + $0x3e0] sm:$0xff] }
 0x1f0   : > { %v4823_v52 = vld [vmem:[#allocation27_spill] sm:$0xff]  ;;  %v594_v18 = vadd.f32 %v570_v28, %v3115_v5  ;;  %v595_v9 = vadd.f32 %v571_v32, %v3112_v46  ;;  %v862_v58 = vmul.f32 %v2194_v42, %v822_v26  ;;  %v4826_v5 = vld [vmem:[#allocation25_spill] sm:$0xff]  ;;  %v4827_v28 = vld [vmem:[#allocation30_spill] sm:$0xff] }
 0x1f1   : > { %v1101_v19 = vsel %vm1098_vm5, %v4823_v52, %v4822_v54  ;;  %v1247_v46 = vsel %vm1244_vm6, %v4827_v28, %v4826_v5  ;;  %v2265_v42 = vld [vmem:[%s4706_s2 + $0x4a8] sm:$0xff] }
 0x1f2   : > { %v769_v57 = vpop.permute.xlu1 %768  ;;  %v1152_v26 = vmul.f32 %v2240_v36, %v1101_v19  ;;  %v3599_v19 = vpop.permute.xlu2 %914  ;;  %v2267_v36 = vld [vmem:[%s4706_s2 + $0x4b8] sm:$0xff] }
 0x1f3   : > { %v498_v51 = vpop.permute.xlu0 %497  ;;  %v812_v53 = vsel %vm806_vm3, %v769_v57, %v3246_v29  ;;  %v824_v41 = vsel %vm806_vm3, %v3246_v29, %v769_v57  ;;  %v4825_v57 = vld [vmem:[#allocation36_spill] sm:$0xff] }
 0x1f4   : > { %v3536_v48 = vsel %vm515_vm1, %v3133_v30, %v498_v51  ;;  %v3541_v3 = vsel %vm515_vm1, %v498_v51, %v3133_v30  ;;  %v866_v20 = vmul.f32 %v2198_v31, %v824_v41  ;;  %v867_v29 = vmul.f32 %v2199_v10, %v812_v53  ;;  %v4824_v30 = vld [vmem:[#allocation37_spill] sm:$0xff] }
 0x1f5   : > { %v956_v38 = vsel %vm952_vm4, %v4825_v57, %v4824_v30  ;;  %v968_v31 = vsel %vm952_vm4, %v4824_v30, %v4825_v57  ;;  %v863_v51 = vmul.f32 %v2195_v16, %v810_v60  ;;  %v884_v53 = vadd.f32 %v860_v11, %v738_v21  ;;  %v2241_v30 = vld [vmem:[%s4706_s2 + $0x3e8] sm:$0xff] }
 0x1f6   : > { %v3561_v10 = vadd.f32 %v866_v20, %v744_v63  ;;  %v3563_v59 = vadd.f32 %v867_v29, %v745_v4  ;;  %v885_v41 = vadd.f32 %v861_v12, %v739_v27  ;;  %v1113_v63 = vsel %vm1098_vm5, %v4822_v54, %v4823_v52  ;;  %v2264_v4 = vld [vmem:[%s4706_s2 + $0x4a0] sm:$0xff] }
 0x1f7   : > { %v740_v21 = vadd.f32 %v716_v15, %v594_v18  ;;  %v741_v27 = vadd.f32 %v717_v50, %v595_v9  ;;  %v1008_v11 = vmul.f32 %v2218_v44, %v968_v31  ;;  %v1009_v12 = vmul.f32 %v2219_v1, %v956_v38  ;;  %v4828_v44 = vld [vmem:[#allocation38_spill] sm:$0xff]  ;;  %v2266_v31 = vld [vmem:[%s4706_s2 + $0x4b0] sm:$0xff] }
 0x1f8   : > { %v1030_v32 = vadd.f32 %v1006_v13, %v884_v53  ;;  %v1031_v60 = vadd.f32 %v1007_v25, %v885_v41  ;;  %v1259_v16 = vsel %vm1244_vm6, %v4826_v5, %v4827_v28  ;;  %v1153_v29 = vmul.f32 %v2241_v30, %v1113_v63  ;;  %v2242_v13 = vld [vmem:[%s4706_s2 + $0x3f0] sm:$0xff]  ;;  %v2243_v25 = vld [vmem:[%s4706_s2 + $0x3f8] sm:$0xff]  ;;  %v4829_v1 = vld [vmem:[#allocation26_spill] sm:$0xff] }
 0x1f9   : > { %v1298_v54 = vmul.f32 %v2264_v4, %v1247_v46  ;;  %v886_v52 = vadd.f32 %v862_v58, %v740_v21  ;;  %v887_v15 = vadd.f32 %v863_v51, %v741_v27  ;;  %v1102_v57 = vsel %vm1098_vm5, %v4829_v1, %v4828_v44  ;;  %v4830_v18 = vld [vmem:[#allocation40_spill] sm:$0xff]  ;;  %v2361_v51 = vld [vmem:[%s4705_s1 + $0x28] sm:$0xff]  ;;  %v2291_v46 = vld [vmem:[%s4706_s2 + $0x578] sm:$0xff] }
 0x1fa   : > { %v3591_v20 = vpop.permute.xlu1 %1086  ;;  %v1114_v38 = vsel %vm1098_vm5, %v4828_v44, %v4829_v1  ;;  %v1248_v9 = vsel %vm1244_vm6, %v3123_v8, %v4830_v18  ;;  %v1260_v58 = vsel %vm1244_vm6, %v4830_v18, %v3123_v8  ;;  %v1299_v53 = vmul.f32 %v2265_v42, %v1259_v16  ;;  %v4831_v41 = vld [vmem:[#allocation28_spill] sm:$0xff]  ;;  %2133 = vmatmul.msk.bf16.gmra.mxu0 %vm319_vm0, %v2361_v51  ;;  %v4834_v18 = vld [vmem:[#allocation14_spill] sm:$0xff] }
 0x1fb   : > { %v3601_v50 = vpop.permute.xlu0 %1062  ;;  %v4832_v30 = vld [vmem:[#allocation32_spill] sm:$0xff]  ;;  %v1032_v4 = vadd.f32 %v1008_v11, %v886_v52  ;;  %v1033_v5 = vadd.f32 %v1009_v12, %v887_v15  ;;  %v1394_v21 = vsel %vm1390_vm7, %v3428_v22, %v3415_v24  ;;  %v1406_v27 = vsel %vm1390_vm7, %v3415_v24, %v3428_v22  ;;  %2139 = vmatmul.msk.bf16.gmra.mxu1 %vm319_vm0, %v2361_v51  ;;  %v2288_v11 = vld [vmem:[%s4706_s2 + $0x560] sm:$0xff]  ;;  %v2289_v12 = vld [vmem:[%s4706_s2 + $0x568] sm:$0xff] }
 0x1fc   : > { %v1393_v63 = vsel %vm1390_vm7, %v4832_v30, %v4831_v41  ;;  %v1405_v28 = vsel %vm1390_vm7, %v4831_v41, %v4832_v30  ;;  %v2290_v8 = vld [vmem:[%s4706_s2 + $0x570] sm:$0xff]  ;;  %v1154_v42 = vmul.f32 %v2242_v13, %v1102_v57  ;;  %v1155_v16 = vmul.f32 %v2243_v25, %v1114_v38  ;;  %v2312_v24 = vld [vmem:[%s4706_s2 + $0x620] sm:$0xff]  ;;  %v2313_v13 = vld [vmem:[%s4706_s2 + $0x628] sm:$0xff] }
 0x1fd   : > { %v1300_v52 = vmul.f32 %v2266_v31, %v1248_v9  ;;  %v1301_v15 = vmul.f32 %v2267_v36, %v1260_v58  ;;  %v1176_v44 = vadd.f32 %v1152_v26, %v1030_v32  ;;  %v1177_v1 = vadd.f32 %v1153_v29, %v1031_v60  ;;  %v4833_v22 = vld [vmem:[#allocation34_spill] sm:$0xff]  ;;  %v2314_v25 = vld [vmem:[%s4706_s2 + $0x630] sm:$0xff]  ;;  %v2315_v57 = vld [vmem:[%s4706_s2 + $0x638] sm:$0xff] }
 0x1fe   : > { %v1539_v51 = vsel %vm1536_vm8, %v4834_v18, %v4833_v22  ;;  %v1551_v41 = vsel %vm1536_vm8, %v4833_v22, %v4834_v18  ;;  %v1178_v32 = vadd.f32 %v1154_v42, %v1032_v4  ;;  %v1179_v60 = vadd.f32 %v1155_v16, %v1033_v5  ;;  %v549_v16 = vld [vmem:[%s4706_s2 + $0x48] sm:$0xff] }
 0x1ff   : > { %v1446_v26 = vmul.f32 %v2290_v8, %v1394_v21  ;;  %v1447_v29 = vmul.f32 %v2291_v46, %v1406_v27  ;;  %v1322_v38 = vadd.f32 %v1298_v54, %v1176_v44  ;;  %v1323_v31 = vadd.f32 %v1299_v53, %v1177_v1 }
 0x200   : > { %v1444_v36 = vmul.f32 %v2288_v11, %v1393_v63  ;;  %v1445_v9 = vmul.f32 %v2289_v12, %v1405_v28  ;;  %v1324_v30 = vadd.f32 %v1300_v52, %v1178_v32  ;;  %v1325_v22 = vadd.f32 %v1301_v15, %v1179_v60  ;;  %v3686_v28 = vpop.permute.xlu2 %1232 }
 0x201   : > { %v1590_v8 = vmul.f32 %v2312_v24, %v1539_v51  ;;  %v1591_v46 = vmul.f32 %v2313_v13, %v1551_v41  ;;  %v1466_v27 = vadd.f32 %v3372_v56, %v3399_v55  ;;  %v1467_v11 = vadd.f32 %v3397_v39, %v3417_v47  ;;  %v2148_v56 = vld [vmem:[%s4706_s2 + $0x340] sm:$0xff]  ;;  %v2149_v39 = vld [vmem:[%s4706_s2 + $0x348] sm:$0xff] }
 0x202   : > { %v1495_v58 = vpop.permute.xlu1 %1494  ;;  %v1470_v53 = vadd.f32 %v1446_v26, %v1324_v30  ;;  %v1471_v63 = vadd.f32 %v1447_v29, %v1325_v22  ;;  %v1468_v12 = vadd.f32 %v1444_v36, %v1322_v38  ;;  %v1469_v42 = vadd.f32 %v1445_v9, %v1323_v31 }
 0x203   : > { %v3678_v18 = vpop.permute.xlu0 %1380  ;;  %v1540_v4 = vsel %vm1536_vm8, %v1495_v58, %v3488_v0  ;;  %v1552_v5 = vsel %vm1536_vm8, %v3488_v0, %v1495_v58  ;;  %v548_v0 = vld [vmem:[%s4706_s2 + $0x40] sm:$0xff]  ;;  %v1642_v52 = vadd.f32 %v3370_v14, %v3366_v33  ;;  %v3711_v15 = vadd.f32 %v3430_v23, %v1466_v27  ;;  %v2298_v27 = vld [vmem:[%s4706_s2 + $0x5b0] sm:$0xff] }
 0x204   : > { %v1592_v21 = vmul.f32 %v2314_v25, %v1540_v4  ;;  %v1593_v54 = vmul.f32 %v2315_v57, %v1552_v5  ;;  %v3714_v44 = vadd.f32 %v3462_v45, %v1467_v11  ;;  %v3716_v1 = vadd.f32 %v1590_v8, %v1468_v12  ;;  %v2172_v23 = vld [vmem:[%s4706_s2 + $0x100] sm:$0xff]  ;;  %v2173_v45 = vld [vmem:[%s4706_s2 + $0x108] sm:$0xff]  ;;  %v2299_v11 = vld [vmem:[%s4706_s2 + $0x5b8] sm:$0xff] }
 0x205   : > { %v3718_v33 = vadd.f32 %v1591_v46, %v1469_v42  ;;  %v572_v14 = vmul.f32 %v548_v0, %v3541_v3  ;;  %v573_v24 = vmul.f32 %v549_v16, %v3536_v48  ;;  %v449_v51 = vmul.f32 %v2148_v56, %v2644_v35  ;;  %v2322_v56 = vld [vmem:[%s4706_s2 + $0x670] sm:$0xff] }
 0x206   : > { %v3706_v55 = vadd.f32 %v1592_v21, %v1470_v53  ;;  %v3708_v47 = vadd.f32 %v1593_v54, %v1471_v63  ;;  %v450_v41 = vmul.f32 %v2149_v39, %v2648_v37  ;;  %v1636_v35 = vmul.f32 %v3711_v15, %v3711_v15  ;;  %v2274_v21 = vld [vmem:[%s4706_s2 + $0x4f0] sm:$0xff]  ;;  %v2275_v54 = vld [vmem:[%s4706_s2 + $0x4f8] sm:$0xff] }
 0x207   : > { %v1637_v37 = vmul.f32 %v3714_v44, %v3714_v44  ;;  %v1638_v29 = vmul.f32 %v3716_v1, %v3716_v1  ;;  %v1639_v25 = vmul.f32 %v3718_v33, %v3718_v33  ;;  %v596_v57 = vadd.f32 %v572_v14, %v449_v51  ;;  %v2323_v39 = vld [vmem:[%s4706_s2 + $0x678] sm:$0xff] }
 0x208   : > { %v1640_v3 = vmul.f32 %v3706_v55, %v3706_v55  ;;  %v1641_v48 = vmul.f32 %v3708_v47, %v3708_v47  ;;  %v597_v38 = vadd.f32 %v573_v24, %v450_v41  ;;  %v3746_v9 = vpop.permute.xlu2 %766  ;;  %v1252_v53 = vsel %vm1244_vm6, %v3300_v62, %v3031_v6 }
 0x209   : > { %1643 = vadd.xlane.f32.xlu2 %v1642_v52  ;;  %v1648_v4 = vadd.f32 %v1639_v25, %v1638_v29  ;;  %v1645_v5 = vadd.f32 %v1637_v37, %v1636_v35  ;;  %v1264_v63 = vsel %vm1244_vm6, %v3031_v6, %v3300_v62  ;;  %v1398_v12 = vsel %vm1390_vm7, %v3360_v49, %v3678_v18 }
 0x20a   : > { %v645_v13 = vpop.permute.xlu1 %644  ;;  %v1651_v22 = vadd.f32 %v1641_v48, %v1640_v3  ;;  %v1410_v42 = vsel %vm1390_vm7, %v3678_v18, %v3360_v49  ;;  %v1308_v0 = vmul.f32 %v2274_v21, %v1252_v53  ;;  %v1309_v6 = vmul.f32 %v2275_v54, %v1264_v63  ;;  %v2272_v21 = vld [vmem:[%s4706_s2 + $0x4e0] sm:$0xff]  ;;  %v2273_v54 = vld [vmem:[%s4706_s2 + $0x4e8] sm:$0xff] }
 0x20b   : > { %v621_v32 = vpop.permute.xlu0 %620  ;;  %v1454_v62 = vmul.f32 %v2298_v27, %v1398_v12  ;;  %v1455_v16 = vmul.f32 %v2299_v11, %v1410_v42  ;;  %v2296_v27 = vld [vmem:[%s4706_s2 + $0x5a0] sm:$0xff]  ;;  %v2297_v11 = vld [vmem:[%s4706_s2 + $0x5a8] sm:$0xff] }
 0x20c   : > { %v665_v60 = vsel %vm660_vm2, %v621_v32, %v645_v13  ;;  %v677_v26 = vsel %vm660_vm2, %v645_v13, %v621_v32  ;;  %v1332_v24 = vadd.f32 %v1308_v0, %v3176_v61  ;;  %v1333_v51 = vadd.f32 %v1309_v6, %v3178_v2 }
 0x20d   : > { %v718_v31 = vmul.f32 %v2172_v23, %v677_v26  ;;  %v719_v36 = vmul.f32 %v2173_v45, %v665_v60 }
 0x20e   : > { %v1478_v23 = vadd.f32 %v1454_v62, %v1332_v24  ;;  %v1479_v45 = vadd.f32 %v1455_v16, %v1333_v51 }
 0x20f   : > { %v3748_v58 = vadd.f32 %v718_v31, %v596_v57  ;;  %v3750_v30 = vadd.f32 %v719_v36, %v597_v38  ;;  %v2248_v38 = vld [vmem:[%s4706_s2 + $0x420] sm:$0xff]  ;;  %v2249_v31 = vld [vmem:[%s4706_s2 + $0x428] sm:$0xff]  ;;  %v1105_v36 = vsel %vm1098_vm5, %v3601_v50, %v3591_v20 }
 0x210   : > { %v3782_v52 = vpop.permute.xlu2 %1084 }
 0x211   : > { %1652 = vadd.xlane.f32.xlu2 %v1651_v22  ;;  %v1117_v22 = vsel %vm1098_vm5, %v3591_v20, %v3601_v50  ;;  %v1160_v20 = vmul.f32 %v2248_v38, %v1105_v36  ;;  %v2222_v36 = vld [vmem:[%s4706_s2 + $0x290] sm:$0xff] }
 0x212   : > { %1649 = vadd.xlane.f32.xlu1 %v1648_v4  ;;  %v1209_v8 = vpop.permute.xlu1 %1208  ;;  %v1161_v50 = vmul.f32 %v2249_v31, %v1117_v22  ;;  %v2223_v22 = vld [vmem:[%s4706_s2 + $0x298] sm:$0xff] }
 0x213   : > { %1646 = vadd.xlane.f32.xlu0 %v1645_v5  ;;  %v3752_v46 = vpop.permute.xlu0 %938  ;;  %v1251_v53 = vsel %vm1244_vm6, %v1209_v8, %v3686_v28  ;;  %v1263_v63 = vsel %vm1244_vm6, %v3686_v28, %v1209_v8  ;;  %v1184_v28 = vadd.f32 %v1160_v20, %v3355_v40  ;;  %v2246_v20 = vld [vmem:[%s4706_s2 + $0x410] sm:$0xff] }
 0x214   : > { %v1306_v0 = vmul.f32 %v2272_v21, %v1251_v53  ;;  %v1307_v6 = vmul.f32 %v2273_v54, %v1263_v63  ;;  %v1185_v8 = vadd.f32 %v1161_v50, %v3358_v34  ;;  %v958_v21 = vsel %vm952_vm4, %v3599_v19, %v3752_v46  ;;  %v2247_v50 = vld [vmem:[%s4706_s2 + $0x418] sm:$0xff] }
 0x215   : > { %v970_v54 = vsel %vm952_vm4, %v3752_v46, %v3599_v19  ;;  %v1013_v63 = vmul.f32 %v2223_v22, %v958_v21  ;;  %v2196_v19 = vld [vmem:[%s4706_s2 + $0x1c0] sm:$0xff]  ;;  %v2197_v46 = vld [vmem:[%s4706_s2 + $0x1c8] sm:$0xff]  ;;  %v2318_v21 = vld [vmem:[%s4706_s2 + $0x650] sm:$0xff] }
 0x216   : > { %v1330_v51 = vadd.f32 %v1306_v0, %v1184_v28  ;;  %v1012_v53 = vmul.f32 %v2222_v36, %v970_v54  ;;  %v2271_v28 = vld [vmem:[%s4706_s2 + $0x4d8] sm:$0xff] }
 0x217   : > { %v2319_v54 = vld [vmem:[%s4706_s2 + $0x658] sm:$0xff] }
 0x218   : > { %v3804_v37 = vpop.permute.xlu2 %912 }
 0x21a   : > { %v1527_v14 = vpop.permute.xlu1 %1526 }
 0x21b   : > { %v1503_v49 = vpop.permute.xlu0 %1502 }
 0x21c   : > { %v1544_v18 = vsel %vm1536_vm8, %v1503_v49, %v1527_v14  ;;  %v1556_v41 = vsel %vm1536_vm8, %v1527_v14, %v1503_v49  ;;  %v2321_v14 = vld [vmem:[%s4706_s2 + $0x668] sm:$0xff]  ;;  %v1331_v49 = vadd.f32 %v1307_v6, %v1185_v8  ;;  %v2270_v6 = vld [vmem:[%s4706_s2 + $0x4d0] sm:$0xff] }
 0x21d   : > { %v1600_v13 = vmul.f32 %v2322_v56, %v1544_v18  ;;  %v1601_v32 = vmul.f32 %v2323_v39, %v1556_v41  ;;  %v2320_v39 = vld [vmem:[%s4706_s2 + $0x660] sm:$0xff] }
 0x21f   : > { %v3796_v3 = vadd.f32 %v1600_v13, %v1478_v23  ;;  %v3798_v48 = vadd.f32 %v1601_v32, %v1479_v45 }
 0x220   : > { %v3808_v57 = vpop.permute.xlu2 %1230 }
 0x221   : > { %v1704_v61 = vmul.f32 %v3796_v3, %v3796_v3  ;;  %v1705_v2 = vmul.f32 %v3798_v48, %v3798_v48 }
 0x222   : > { %v1061_v35 = vpop.permute.xlu1 %1060 }
 0x223   : > { %v3806_v60 = vpop.permute.xlu0 %790  ;;  %v1715_v26 = vadd.f32 %v1705_v2, %v1704_v61 }
 0x224   : > { %v823_v0 = vsel %vm806_vm3, %v3806_v60, %v3746_v9 }
 0x225   : > { %1716 = vadd.xlane.f32.xlu2 %v1715_v26 }
 0x228   : > { %v3848_v62 = vpop.permute.xlu2 %1058 }
 0x22a   : > { %v1379_v29 = vpop.permute.xlu1 %1378 }
 0x22b   : > { %v1355_v25 = vpop.permute.xlu0 %1354 }
 0x22c   : > { %v1397_v12 = vsel %vm1390_vm7, %v1355_v25, %v1379_v29  ;;  %v1409_v42 = vsel %vm1390_vm7, %v1379_v29, %v1355_v25 }
 0x22d   : > { %v1452_v16 = vmul.f32 %v2296_v27, %v1397_v12  ;;  %v1453_v56 = vmul.f32 %v2297_v11, %v1409_v42  ;;  %v1104_v27 = vsel %vm1098_vm5, %v1061_v35, %v3782_v52  ;;  %v1116_v11 = vsel %vm1098_vm5, %v3782_v52, %v1061_v35 }
 0x22e   : > { %v811_v42 = vsel %vm806_vm3, %v3746_v9, %v3806_v60  ;;  %v1036_v9 = vadd.f32 %v1012_v53, %v3561_v10  ;;  %v1037_v60 = vadd.f32 %v1013_v63, %v3563_v59  ;;  %v2220_v59 = vld [vmem:[%s4706_s2 + $0x280] sm:$0xff] }
 0x22f   : > { %v1476_v34 = vadd.f32 %v1452_v16, %v1330_v51  ;;  %v1477_v23 = vadd.f32 %v1453_v56, %v1331_v49  ;;  %v1158_v56 = vmul.f32 %v2246_v20, %v1104_v27  ;;  %v2294_v51 = vld [vmem:[%s4706_s2 + $0x590] sm:$0xff]  ;;  %v2295_v49 = vld [vmem:[%s4706_s2 + $0x598] sm:$0xff] }
 0x230   : > { %v1377_v2 = vpop.permute.xlu2 %1376 }
 0x232   : > { %v1207_v4 = vpop.permute.xlu1 %1206 }
 0x233   : > { %v3824_v5 = vpop.permute.xlu0 %936  ;;  %v1250_v8 = vsel %vm1244_vm6, %v1207_v4, %v3808_v57  ;;  %v1262_v16 = vsel %vm1244_vm6, %v3808_v57, %v1207_v4  ;;  %v2221_v57 = vld [vmem:[%s4706_s2 + $0x288] sm:$0xff] }
 0x234   : > { %v957_v4 = vsel %vm952_vm4, %v3804_v37, %v3824_v5 }
 0x235   : > { %v1011_v22 = vmul.f32 %v2221_v57, %v957_v4  ;;  %v2316_v4 = vld [vmem:[%s4706_s2 + $0x640] sm:$0xff] }
 0x238   : > { %v1499_v52 = vpop.permute.xlu2 %1498 }
 0x23a   : > { %v1525_v24 = vpop.permute.xlu1 %1524 }
 0x23b   : > { %v1501_v18 = vpop.permute.xlu0 %1500 }
 0x23c   : > { %v1543_v41 = vsel %vm1536_vm8, %v1501_v18, %v1525_v24  ;;  %v1555_v40 = vsel %vm1536_vm8, %v1525_v24, %v1501_v18  ;;  %v865_v24 = vmul.f32 %v2197_v46, %v811_v42 }
 0x23d   : > { %v1598_v45 = vmul.f32 %v2320_v39, %v1543_v41  ;;  %v1599_v13 = vmul.f32 %v2321_v14, %v1555_v40  ;;  %v1159_v39 = vmul.f32 %v2247_v50, %v1116_v11  ;;  %v864_v14 = vmul.f32 %v2196_v19, %v823_v0 }
 0x23e   : > { %v969_v41 = vsel %vm952_vm4, %v3824_v5, %v3804_v37  ;;  %v1304_v40 = vmul.f32 %v2270_v6, %v1250_v8 }
 0x23f   : > { %v3862_v32 = vadd.f32 %v1598_v45, %v1476_v34  ;;  %v3864_v61 = vadd.f32 %v1599_v13, %v1477_v23  ;;  %v1305_v34 = vmul.f32 %v2271_v28, %v1262_v16  ;;  %v2244_v23 = vld [vmem:[%s4706_s2 + $0x400] sm:$0xff]  ;;  %v2245_v45 = vld [vmem:[%s4706_s2 + $0x408] sm:$0xff]  ;;  %v1183_v37 = vadd.f32 %v1159_v39, %v1037_v60 }
 0x240   : > { %v1010_v36 = vmul.f32 %v2220_v59, %v969_v41  ;;  %v1375_v42 = vpop.permute.xlu2 %1374  ;;  %v2292_v60 = vld [vmem:[%s4706_s2 + $0x580] sm:$0xff]  ;;  %v2317_v41 = vld [vmem:[%s4706_s2 + $0x648] sm:$0xff] }
 0x241   : > { %v1702_v26 = vmul.f32 %v3862_v32, %v3862_v32  ;;  %v1703_v29 = vmul.f32 %v3864_v61, %v3864_v61 }
 0x242   : > { %v1353_v25 = vpop.permute.xlu1 %1352 }
 0x243   : > { %v1083_v38 = vpop.permute.xlu0 %1082  ;;  %v1712_v31 = vadd.f32 %v1703_v29, %v1702_v26  ;;  %v1396_v18 = vsel %vm1390_vm7, %v1353_v25, %v1377_v2  ;;  %v1408_v10 = vsel %vm1390_vm7, %v1377_v2, %v1353_v25  ;;  %v1182_v26 = vadd.f32 %v1158_v56, %v1036_v9 }
 0x244   : > { %v1103_v13 = vsel %vm1098_vm5, %v3848_v62, %v1083_v38  ;;  %v1115_v2 = vsel %vm1098_vm5, %v1083_v38, %v3848_v62  ;;  %v1450_v5 = vmul.f32 %v2294_v51, %v1396_v18  ;;  %v1451_v29 = vmul.f32 %v2295_v49, %v1408_v10 }
 0x245   : > { %1713 = vadd.xlane.f32.xlu0 %v1712_v31  ;;  %v888_v25 = vadd.f32 %v864_v14, %v3748_v58  ;;  %v889_v31 = vadd.f32 %v865_v24, %v3750_v30  ;;  %v1328_v62 = vadd.f32 %v1304_v40, %v1182_v26  ;;  %v1329_v38 = vadd.f32 %v1305_v34, %v1183_v37  ;;  %v2268_v58 = vld [vmem:[%s4706_s2 + $0x4c0] sm:$0xff]  ;;  %v2269_v30 = vld [vmem:[%s4706_s2 + $0x4c8] sm:$0xff] }
 0x246   : > { %v1156_v63 = vmul.f32 %v2244_v23, %v1103_v13  ;;  %v1157_v20 = vmul.f32 %v2245_v45, %v1115_v2 }
 0x247   : > { %v1474_v0 = vadd.f32 %v1450_v5, %v1328_v62  ;;  %v1475_v6 = vadd.f32 %v1451_v29, %v1329_v38  ;;  %v1034_v16 = vadd.f32 %v1010_v36, %v888_v25  ;;  %v1035_v9 = vadd.f32 %v1011_v22, %v889_v31 }
 0x249   : > { %v1180_v51 = vadd.f32 %v1156_v63, %v1034_v16  ;;  %v1181_v49 = vadd.f32 %v1157_v20, %v1035_v9 }
 0x24a   : > { %v1229_v12 = vpop.permute.xlu1 %1228 }
 0x24b   : > { %v1205_v35 = vpop.permute.xlu0 %1204 }
 0x24c   : > { %v1249_v27 = vsel %vm1244_vm6, %v1205_v35, %v1229_v12  ;;  %v1261_v11 = vsel %vm1244_vm6, %v1229_v12, %v1205_v35  ;;  %v2293_v12 = vld [vmem:[%s4706_s2 + $0x588] sm:$0xff] }
 0x24d   : > { %v1302_v56 = vmul.f32 %v2268_v58, %v1249_v27  ;;  %v1303_v39 = vmul.f32 %v2269_v30, %v1261_v11 }
 0x24f   : > { %v1326_v34 = vadd.f32 %v1302_v56, %v1180_v51  ;;  %v1327_v23 = vadd.f32 %v1303_v39, %v1181_v49 }
 0x252   : > { %v1351_v53 = vpop.permute.xlu1 %1350 }
 0x253   : > { %v1523_v50 = vpop.permute.xlu0 %1522  ;;  %v1395_v35 = vsel %vm1390_vm7, %v1351_v53, %v1375_v42 }
 0x254   : > { %v1542_v19 = vsel %vm1536_vm8, %v1499_v52, %v1523_v50  ;;  %v1554_v46 = vsel %vm1536_vm8, %v1523_v50, %v1499_v52  ;;  %v1407_v52 = vsel %vm1390_vm7, %v1375_v42, %v1351_v53  ;;  %v1448_v18 = vmul.f32 %v2292_v60, %v1395_v35 }
 0x255   : > { %v1596_v28 = vmul.f32 %v2318_v21, %v1542_v19  ;;  %v1597_v8 = vmul.f32 %v2319_v54, %v1554_v46  ;;  %v1449_v10 = vmul.f32 %v2293_v12, %v1407_v52  ;;  %v2432_v53 = vmov 0   ;;  %v269_v52 = vld [vmem:[%s4707_s3] sm:$0xff] }
 0x256   : > { %v1472_v37 = vadd.f32 %v1448_v18, %v1326_v34  ;;  %2381 = vset.pattern.permute.xlu0 %v2432_v53  ;;  %2383 = vset.pattern.permute.xlu2 %v2432_v53 }
 0x257   : > { %v3992_v14 = vadd.f32 %v1596_v28, %v1474_v0  ;;  %v3994_v24 = vadd.f32 %v1597_v8, %v1475_v6  ;;  %v1473_v5 = vadd.f32 %v1449_v10, %v1327_v23  ;;  %2382 = vset.pattern.permute.xlu1 %v2432_v53 }
 0x259   : > { %v1700_v59 = vmul.f32 %v3992_v14, %v3992_v14  ;;  %v1701_v57 = vmul.f32 %v3994_v24, %v3994_v24 }
 0x25a   : > { %v1521_v40 = vpop.permute.xlu1 %1520 }
 0x25b   : > { %v1497_v45 = vpop.permute.xlu0 %1496  ;;  %v1709_v13 = vadd.f32 %v1701_v57, %v1700_v59 }
 0x25c   : > { %v1541_v2 = vsel %vm1536_vm8, %v1497_v45, %v1521_v40  ;;  %v1553_v26 = vsel %vm1536_vm8, %v1521_v40, %v1497_v45 }
 0x25d   : > { %v1594_v29 = vmul.f32 %v2316_v4, %v1541_v2  ;;  %v1595_v25 = vmul.f32 %v2317_v41, %v1553_v26  ;;  %1710 = vadd.xlane.f32.xlu1 %v1709_v13  ;;  %v271_v2 = vld [vmem:[%s4707_s3 + $0x10] sm:$0xff] }
 0x25f   : > { %v4010_v31 = vadd.f32 %v1594_v29, %v1472_v37  ;;  %v4012_v36 = vadd.f32 %v1595_v25, %v1473_v5  ;;  %v270_v29 = vld [vmem:[%s4707_s3 + $0x8] sm:$0xff] }
 0x261   : > { %v1698_v22 = vmul.f32 %v4010_v31, %v4010_v31  ;;  %v1699_v21 = vmul.f32 %v4012_v36, %v4012_v36 }
 0x263   : > { %v1706_v54 = vadd.f32 %v1699_v21, %v1698_v22 }
 0x265   : > { %1707 = vadd.xlane.f32.xlu2 %v1706_v54 }
 0x267   : > { %v4018_v38 = vpop.f32.mrf.mxu0  ;;  %v4020_v20 = vpop.f32.mrf.mxu1 }
 0x26f   : > { %v4022_v8 = vpop.f32.mrf.mxu0  ;;  %v4024_v60 = vpop.f32.mrf.mxu1 }
 0x277   : > { %v4029_v45 = vpop.f32.mrf.mxu0 }
 0x278   : > { %v4031_v13 = vpop.f32.mrf.mxu1 }
 0x27c   : > { %v1644_v62 = vpop.xlane.xlu2 %1643 }
 0x27d   : > { %2384 = vrsqrt.f32 %v1644_v62  ;;  %vm1660_vm10 = vweird.f32 %v1644_v62 }
 0x283   : > { %v2385_v63 = vpop.eup %2384 }
 0x284   : > { %v1655_v50 = vmul.f32 %v2385_v63, %v1644_v62  ;;  %v1653_v58 = vpop.xlane.xlu2 %1652  ;;  %vm1661_vm9 = vweird.f32 %v2385_v63 }
 0x285   : > { %2386 = vrsqrt.f32 %v1653_v58  ;;  %v1650_v30 = vpop.xlane.xlu1 %1649  ;;  %vm1662_vm11 = vmor %vm1660_vm10, %vm1661_vm9 }
 0x286   : > { %v1656_v27 = vmul.f32 %v2385_v63, %v1655_v50  ;;  %v1647_v11 = vpop.xlane.xlu0 %1646  ;;  %2388 = vrsqrt.f32 %v1650_v30  ;;  %vm1680_vm14 = vweird.f32 %v1650_v30 }
 0x287   : > { %2390 = vrsqrt.f32 %v1647_v11  ;;  %vm1670_vm15 = vweird.f32 %v1647_v11 }
 0x288   : > { %v1657_v19 = vmul.f32 0.5, %v1656_v27  ;;  %v4041_v27 = vpop.f32.mrf.mxu0 }
 0x28a   : > { %v1658_v46 = vsub.f32 1.5, %v1657_v19  ;;  %v4046_v19 = vpop.f32.mrf.mxu1 }
 0x28b   : > { %v2387_v42 = vpop.eup %2386 }
 0x28c   : > { %v2389_v0 = vpop.eup %2388  ;;  %v1659_v6 = vmul.f32 %v2385_v63, %v1658_v46  ;;  %v1685_v28 = vmul.f32 %v2387_v42, %v1653_v58 }
 0x28d   : > { %v2391_v16 = vpop.eup %2390  ;;  %v1675_v9 = vmul.f32 %v2389_v0, %v1650_v30  ;;  %vm1681_vm12 = vweird.f32 %v2389_v0 }
 0x28e   : > { %v1686_v12 = vmul.f32 %v2387_v42, %v1685_v28  ;;  %v1665_v35 = vmul.f32 %v2391_v16, %v1647_v11  ;;  %v1663_v56 = vsel %vm1662_vm11, %v2385_v63, %v1659_v6  ;;  %vm1671_vm13 = vweird.f32 %v2391_v16  ;;  %vm1682_vm9 = vmor %vm1680_vm14, %vm1681_vm12  ;;  %v272_v11 = vld [vmem:[%s4707_s3 + $0x18] sm:$0xff] }
 0x28f   : > { %v1676_v39 = vmul.f32 %v2389_v0, %v1675_v9  ;;  %v1694_v51 = vmin.f32 %v1663_v56, 1e+12  ;;  %vm1672_vm10 = vmor %vm1670_vm15, %vm1671_vm13  ;;  %vm1691_vm11 = vweird.f32 %v2387_v42  ;;  %vm1690_vm12 = vweird.f32 %v1653_v58 }
 0x290   : > { %v1687_v49 = vmul.f32 0.5, %v1686_v12  ;;  %v1666_v18 = vmul.f32 %v2391_v16, %v1665_v35  ;;  %vm1692_vm13 = vmor %vm1690_vm12, %vm1691_vm11 }
 0x291   : > { %v1677_v10 = vmul.f32 0.5, %v1676_v39  ;;  %v1762_v59 = vmul.f32 %v1694_v51, %v269_v52 }
 0x292   : > { %v1667_v57 = vmul.f32 0.5, %v1666_v18  ;;  %v1688_v41 = vsub.f32 1.5, %v1687_v49 }
 0x293   : > { %v1678_v4 = vsub.f32 1.5, %v1677_v10  ;;  %1768 = vperm.xlu0 %2381, %v1762_v59  }
 0x294   : > { %v1668_v40 = vsub.f32 1.5, %v1667_v57  ;;  %v1689_v37 = vmul.f32 %v2387_v42, %v1688_v41 }
 0x295   : > { %v1679_v34 = vmul.f32 %v2389_v0, %v1678_v4 }
 0x296   : > { %v1669_v23 = vmul.f32 %v2391_v16, %v1668_v40  ;;  %v1693_v62 = vsel %vm1692_vm13, %v2387_v42, %v1689_v37 }
 0x297   : > { %v1683_v26 = vsel %vm1682_vm9, %v2389_v0, %v1679_v34  ;;  %v1697_v50 = vmin.f32 %v1693_v62, 1e+12 }
 0x298   : > { %v1717_v5 = vpop.xlane.xlu2 %1716  ;;  %v1673_v25 = vsel %vm1672_vm10, %v2391_v16, %v1669_v23  ;;  %v1696_v22 = vmin.f32 %v1683_v26, 1e+12 }
 0x299   : > { %2392 = vrsqrt.f32 %v1717_v5  ;;  %v1695_v21 = vmin.f32 %v1673_v25, 1e+12  ;;  %v1765_v46 = vmul.f32 %v1697_v50, %v272_v11  ;;  %vm1754_vm15 = vweird.f32 %v1717_v5 }
 0x29a   : > { %v1764_v54 = vmul.f32 %v1696_v22, %v271_v2 }
 0x29b   : > { %485 = vrot.lane.b32.xlu0 %v4029_v45, %s2426_s13  ;;  %v1763_v53 = vmul.f32 %v1695_v21, %v270_v29 }
 0x29c   : > { %1778 = vperm.xlu2 %2383, %v1764_v54  }
 0x29d   : > { %1773 = vperm.xlu1 %2382, %v1763_v53  }
 0x29f   : > { %v2393_v63 = vpop.eup %2392 }
 0x2a0   : > { %v1749_v30 = vmul.f32 %v2393_v63, %v1717_v5  ;;  %vm1755_vm14 = vweird.f32 %v2393_v63 }
 0x2a1   : > { %vm1756_vm9 = vmor %vm1754_vm15, %vm1755_vm14 }
 0x2a2   : > { %v1750_v58 = vmul.f32 %v2393_v63, %v1749_v30 }
 0x2a3   : > { %634 = vrot.lane.b32.xlu0 %v4041_v27, %s2425_s12 }
 0x2a4   : > { %v1751_v0 = vmul.f32 0.5, %v1750_v58  ;;  %511 = vrot.lane.b32.xlu2 %v4046_v19, %s2426_s13 }
 0x2a5   : > { %1783 = vperm.xlu1 %2382, %v1765_v46  }
 0x2a6   : > { %v1752_v42 = vsub.f32 1.5, %v1751_v0 }
 0x2a8   : > { %v1753_v6 = vmul.f32 %v2393_v63, %v1752_v42 }
 0x2aa   : > { %v1757_v28 = vsel %vm1756_vm9, %v2393_v63, %v1753_v6 }
 0x2ab   : > { %507 = vrot.lane.b32.xlu0 %v4024_v60, %s2426_s13  ;;  %v1761_v16 = vmin.f32 %v1757_v28, 1e+12 }
 0x2ac   : > { %658 = vrot.lane.b32.xlu2 %v4046_v19, %s2425_s12 }
 0x2ad   : > { %487 = vrot.lane.b32.xlu1 %v4041_v27, %s2426_s13  ;;  %v1800_v9 = vmul.f32 %v1761_v16, %v3796_v3  ;;  %v1801_v12 = vmul.f32 %v1761_v16, %v3798_v48 }
 0x2af   : > { %1814 = vmatpush.xpose.msra.mxu2 %v1800_v9  ;;  %1843 = vmatpush.xpose.msra.mxu3 %v1801_v12 }
 0x2b3   : > { %780 = vrot.lane.b32.xlu0 %v4041_v27, %s2424_s11 }
 0x2b4   : > { %632 = vrot.lane.b32.xlu2 %v4029_v45, %s2425_s12 }
 0x2b5   : > { %509 = vrot.lane.b32.xlu1 %v4031_v13, %s2426_s13 }
 0x2b8   : > { %v1714_v35 = vpop.xlane.xlu0 %1713 }
 0x2b9   : > { %2394 = vrsqrt.f32 %v1714_v35  ;;  %vm1744_vm11 = vweird.f32 %v1714_v35 }
 0x2bb   : > { %505 = vrot.lane.b32.xlu0 %v4020_v20, %s2426_s13 }
 0x2bc   : > { %804 = vrot.lane.b32.xlu2 %v4046_v19, %s2424_s11 }
 0x2bd   : > { %483 = vrot.lane.b32.xlu1 %v4022_v8, %s2426_s13 }
 0x2bf   : > { %v2395_v3 = vpop.eup %2394 }
 0x2c0   : > { %v1739_v48 = vmul.f32 %v2395_v3, %v1714_v35  ;;  %vm1745_vm10 = vweird.f32 %v2395_v3  ;;  %v2162_v35 = vld [vmem:[%s4706_s2 + $0x3b0] sm:$0xff] }
 0x2c1   : > { %vm1746_vm12 = vmor %vm1744_vm11, %vm1745_vm10 }
 0x2c2   : > { %v1740_v52 = vmul.f32 %v2395_v3, %v1739_v48  ;;  %v2187_v48 = vld [vmem:[%s4706_s2 + $0x178] sm:$0xff] }
 0x2c3   : > { %778 = vrot.lane.b32.xlu0 %v4029_v45, %s2424_s11 }
 0x2c4   : > { %v1741_v56 = vmul.f32 0.5, %v1740_v52  ;;  %630 = vrot.lane.b32.xlu2 %v4022_v8, %s2425_s12 }
 0x2c5   : > { %656 = vrot.lane.b32.xlu1 %v4031_v13, %s2425_s12 }
 0x2c6   : > { %v1742_v39 = vsub.f32 1.5, %v1741_v56  ;;  %v562_v56 = vld [vmem:[%s4706_s2 + $0xb0] sm:$0xff] }
 0x2c8   : > { %v1743_v51 = vmul.f32 %v2395_v3, %v1742_v39  ;;  %v563_v39 = vld [vmem:[%s4706_s2 + $0xb8] sm:$0xff] }
 0x2ca   : > { %v1747_v49 = vsel %vm1746_vm12, %v2395_v3, %v1743_v51  ;;  %v2163_v3 = vld [vmem:[%s4706_s2 + $0x3b8] sm:$0xff] }
 0x2cb   : > { %950 = vrot.lane.b32.xlu0 %v4046_v19, %s2428_s15  ;;  %v1760_v18 = vmin.f32 %v1747_v49, 1e+12  ;;  %v464_v51 = vmul.f32 %v2163_v3, %v4046_v19  ;;  %v2209_v3 = vld [vmem:[%s4706_s2 + $0x228] sm:$0xff] }
 0x2cc   : > { %802 = vrot.lane.b32.xlu2 %v4031_v13, %s2424_s11 }
 0x2cd   : > { %481 = vrot.lane.b32.xlu1 %v4018_v38, %s2426_s13  ;;  %v1798_v10 = vmul.f32 %v1760_v18, %v3862_v32  ;;  %v1799_v59 = vmul.f32 %v1760_v18, %v3864_v61  ;;  %v463_v18 = vmul.f32 %v2162_v35, %v4041_v27  ;;  %v2208_v35 = vld [vmem:[%s4706_s2 + $0x220] sm:$0xff]  ;;  %s251_s13 = scalar_lea.vmem %s4710_s6, %s2354_s23 }
 0x2cf   : > { %1815 = vmatpush.xpose.msra.mxu2 %v1798_v10  ;;  %1844 = vmatpush.xpose.msra.mxu3 %v1799_v59 }
 0x2d0   : > { %v1711_v57 = vpop.xlane.xlu1 %1710 }
 0x2d1   : > { %2396 = vrsqrt.f32 %v1711_v57  ;;  %vm1734_vm14 = vweird.f32 %v1711_v57 }
 0x2d3   : > { %776 = vrot.lane.b32.xlu0 %v4022_v8, %s2424_s11 }
 0x2d4   : > { %628 = vrot.lane.b32.xlu2 %v4018_v38, %s2425_s12 }
 0x2d5   : > { %654 = vrot.lane.b32.xlu1 %v4024_v60, %s2425_s12 }
 0x2d7   : > { %v2397_v4 = vpop.eup %2396 }
 0x2d8   : > { %v1729_v41 = vmul.f32 %v2397_v4, %v1711_v57  ;;  %v1708_v40 = vpop.xlane.xlu2 %1707  ;;  %vm1735_vm13 = vweird.f32 %v2397_v4 }
 0x2d9   : > { %2398 = vrsqrt.f32 %v1708_v40  ;;  %vm1736_vm15 = vmor %vm1734_vm14, %vm1735_vm13  ;;  %vm1724_vm10 = vweird.f32 %v1708_v40 }
 0x2da   : > { %v1730_v32 = vmul.f32 %v2397_v4, %v1729_v41 }
 0x2db   : > { %948 = vrot.lane.b32.xlu0 %v4031_v13, %s2428_s15 }
 0x2dc   : > { %v1731_v61 = vmul.f32 0.5, %v1730_v32  ;;  %800 = vrot.lane.b32.xlu2 %v4024_v60, %s2424_s11 }
 0x2dd   : > { %926 = vrot.lane.b32.xlu1 %v4041_v27, %s2428_s15 }
 0x2de   : > { %v1732_v34 = vsub.f32 1.5, %v1731_v61 }
 0x2df   : > { %v2399_v23 = vpop.eup %2398 }
 0x2e0   : > { %v1719_v2 = vmul.f32 %v2399_v23, %v1708_v40  ;;  %v1733_v26 = vmul.f32 %v2397_v4, %v1732_v34  ;;  %vm1725_vm9 = vweird.f32 %v2399_v23 }
 0x2e1   : > { %vm1726_vm11 = vmor %vm1724_vm10, %vm1725_vm9 }
 0x2e2   : > { %v1720_v37 = vmul.f32 %v2399_v23, %v1719_v2  ;;  %v1737_v5 = vsel %vm1736_vm15, %v2397_v4, %v1733_v26 }
 0x2e3   : > { %774 = vrot.lane.b32.xlu0 %v4018_v38, %s2424_s11  ;;  %v1759_v29 = vmin.f32 %v1737_v5, 1e+12 }
 0x2e4   : > { %v1721_v25 = vmul.f32 0.5, %v1720_v37  ;;  %1072 = vrot.lane.b32.xlu2 %v4041_v27, %s2427_s14 }
 0x2e5   : > { %652 = vrot.lane.b32.xlu1 %v4020_v20, %s2425_s12  ;;  %v1796_v22 = vmul.f32 %v1759_v29, %v3992_v14  ;;  %v1797_v21 = vmul.f32 %v1759_v29, %v3994_v24 }
 0x2e6   : > { %v1722_v54 = vsub.f32 1.5, %v1721_v25 }
 0x2e7   : > { %1816 = vmatpush.xpose.msra.mxu2 %v1796_v22  ;;  %1845 = vmatpush.xpose.msra.mxu3 %v1797_v21 }
 0x2e8   : > { %v1723_v53 = vmul.f32 %v2399_v23, %v1722_v54 }
 0x2ea   : > { %v1727_v62 = vsel %vm1726_vm11, %v2399_v23, %v1723_v53 }
 0x2eb   : > { %946 = vrot.lane.b32.xlu0 %v4024_v60, %s2428_s15  ;;  %v1758_v63 = vmin.f32 %v1727_v62, 1e+12 }
 0x2ec   : > { %798 = vrot.lane.b32.xlu2 %v4020_v20, %s2424_s11 }
 0x2ed   : > { %924 = vrot.lane.b32.xlu1 %v4029_v45, %s2428_s15  ;;  %v1794_v14 = vmul.f32 %v1758_v63, %v4010_v31  ;;  %v1795_v24 = vmul.f32 %v1758_v63, %v4012_v36 }
 0x2ef   : > { %1817 = vmatpush.xpose.msra.mxu2 %v1794_v14  ;;  %1846 = vmatpush.xpose.msra.mxu3 %v1795_v24 }
 0x2f3   : > { %1218 = vrot.lane.b32.xlu0 %v4041_v27, %s2429_s16 }
 0x2f4   : > { %1070 = vrot.lane.b32.xlu2 %v4029_v45, %s2427_s14 }
 0x2f5   : > { %1096 = vrot.lane.b32.xlu1 %v4046_v19, %s2427_s14 }
 0x2f6   : > { %v1779_v50 = vpop.permute.xlu2 %1778 }
 0x2f7   : > { %v1790_v9 = vmul.f32 %v1779_v50, %v3716_v1  ;;  %v1791_v12 = vmul.f32 %v1779_v50, %v3718_v33  ;;  %v2186_v1 = vld [vmem:[%s4706_s2 + $0x170] sm:$0xff] }
 0x2fb   : > { %944 = vrot.lane.b32.xlu0 %v4020_v20, %s2428_s15 }
 0x2fc   : > { %1242 = vrot.lane.b32.xlu2 %v4046_v19, %s2429_s16 }
 0x2fd   : > { %922 = vrot.lane.b32.xlu1 %v4022_v8, %s2428_s15 }
 0x2fe   : > { %v512_v31 = vpop.permute.xlu2 %511 }
 0x303   : > { %1216 = vrot.lane.b32.xlu0 %v4029_v45, %s2429_s16 }
 0x304   : > { %1068 = vrot.lane.b32.xlu2 %v4022_v8, %s2427_s14 }
 0x305   : > { %1094 = vrot.lane.b32.xlu1 %v4031_v13, %s2427_s14  ;;  %v1769_v36 = vpop.permute.xlu0 %1768 }
 0x306   : > { %v659_v30 = vpop.permute.xlu2 %658  ;;  %v1786_v11 = vmul.f32 %v1769_v36, %v3302_v17  ;;  %v1787_v58 = vmul.f32 %v1769_v36, %v3304_v43 }
 0x308   : > { %1818 = vmatmul.f32.vlgmr.msra.gmra.mxu2 %v1786_v11  ;;  %1847 = vmatmul.f32.vlgmr.msra.gmra.mxu3 %v1787_v58  ;;  %v561_v11 = vld [vmem:[%s4706_s2 + $0xa8] sm:$0xff]  ;;  %v2160_v58 = vld [vmem:[%s4706_s2 + $0x3a0] sm:$0xff] }
 0x30b   : > { %1388 = vrot.lane.b32.xlu0 %v4046_v19, %s2431_s18 }
 0x30c   : > { %1240 = vrot.lane.b32.xlu2 %v4031_v13, %s2429_s16 }
 0x30d   : > { %920 = vrot.lane.b32.xlu1 %v4018_v38, %s2428_s15  ;;  %v486_v46 = vpop.permute.xlu0 %485 }
 0x30e   : > { %v4140_v0 = vpop.permute.xlu2 %632 }
 0x30f   : > { %v1774_v42 = vpop.permute.xlu1 %1773 }
 0x310   : > { %v1788_v6 = vmul.f32 %v1774_v42, %v3711_v15  ;;  %v1789_v17 = vmul.f32 %v1774_v42, %v3714_v44 }
 0x312   : > { %1821 = vmatmul.f32.gmra.mxu2 %v1788_v6  ;;  %1850 = vmatmul.f32.gmra.mxu3 %v1789_v17 }
 0x313   : > { %1214 = vrot.lane.b32.xlu0 %v4022_v8, %s2429_s16 }
 0x314   : > { %1066 = vrot.lane.b32.xlu2 %v4018_v38, %s2427_s14 }
 0x315   : > { %1092 = vrot.lane.b32.xlu1 %v4024_v60, %s2427_s14  ;;  %v635_v43 = vpop.permute.xlu0 %634 }
 0x316   : > { %v672_v28 = vsel %vm660_vm2, %v635_v43, %v659_v30  ;;  %v684_v15 = vsel %vm660_vm2, %v659_v30, %v635_v43  ;;  %v805_v16 = vpop.permute.xlu2 %804  ;;  %v560_v30 = vld [vmem:[%s4706_s2 + $0xa0] sm:$0xff] }
 0x317   : > { %v1784_v44 = vpop.permute.xlu1 %1783  ;;  %v732_v41 = vmul.f32 %v2186_v1, %v684_v15  ;;  %v733_v40 = vmul.f32 %v2187_v48, %v672_v28 }
 0x318   : > { %v1792_v57 = vmul.f32 %v1784_v44, %v3706_v55  ;;  %v1793_v4 = vmul.f32 %v1784_v44, %v3708_v47  ;;  %v2210_v55 = vld [vmem:[%s4706_s2 + $0x230] sm:$0xff]  ;;  %v2211_v47 = vld [vmem:[%s4706_s2 + $0x238] sm:$0xff]  ;;  %v2185_v44 = vld [vmem:[%s4706_s2 + $0x168] sm:$0xff] }
 0x31a   : > { %1824 = vmatmul.f32.gmra.mxu2 %v1790_v9  ;;  %1853 = vmatmul.f32.gmra.mxu3 %v1791_v12  ;;  %v461_v9 = vmul.f32 %v2160_v58, %v4029_v45 }
 0x31b   : > { %1386 = vrot.lane.b32.xlu0 %v4031_v13, %s2431_s18 }
 0x31c   : > { %1238 = vrot.lane.b32.xlu2 %v4024_v60, %s2429_s16 }
 0x31d   : > { %1364 = vrot.lane.b32.xlu1 %v4041_v27, %s2431_s18  ;;  %v508_v33 = vpop.permute.xlu0 %507 }
 0x31e   : > { %v4174_v52 = vpop.permute.xlu2 %630 }
 0x31f   : > { %v488_v49 = vpop.permute.xlu1 %487 }
 0x320   : > { %v527_v10 = vsel %vm515_vm1, %v488_v49, %v512_v31  ;;  %v539_v59 = vsel %vm515_vm1, %v512_v31, %v488_v49 }
 0x321   : > { %v586_v32 = vmul.f32 %v562_v56, %v539_v59  ;;  %v587_v61 = vmul.f32 %v563_v39, %v527_v10 }
 0x322   : > { %1827 = vmatmul.f32.gmra.mxu2 %v1792_v57  ;;  %1856 = vmatmul.f32.gmra.mxu3 %v1793_v4 }
 0x323   : > { %v610_v34 = vadd.f32 %v586_v32, %v463_v18  ;;  %v611_v23 = vadd.f32 %v587_v61, %v464_v51  ;;  %1212 = vrot.lane.b32.xlu0 %v4018_v38, %s2429_s16 }
 0x324   : > { %1510 = vrot.lane.b32.xlu2 %v4041_v27, %s2430_s17 }
 0x325   : > { %1090 = vrot.lane.b32.xlu1 %v4020_v20, %s2427_s14  ;;  %v781_v2 = vpop.permute.xlu0 %780  ;;  %v756_v26 = vadd.f32 %v732_v41, %v610_v34  ;;  %v757_v37 = vadd.f32 %v733_v40, %v611_v23  ;;  %v558_v34 = vld [vmem:[%s4706_s2 + $0x90] sm:$0xff]  ;;  %v559_v23 = vld [vmem:[%s4706_s2 + $0x98] sm:$0xff] }
 0x326   : > { %v818_v5 = vsel %vm806_vm3, %v781_v2, %v805_v16  ;;  %v830_v27 = vsel %vm806_vm3, %v805_v16, %v781_v2  ;;  %v803_v29 = vpop.permute.xlu2 %802  ;;  %v2184_v16 = vld [vmem:[%s4706_s2 + $0x160] sm:$0xff] }
 0x327   : > { %v878_v25 = vmul.f32 %v2210_v55, %v830_v27  ;;  %v879_v22 = vmul.f32 %v2211_v47, %v818_v5  ;;  %v510_v21 = vpop.permute.xlu1 %509  ;;  %v2158_v55 = vld [vmem:[%s4706_s2 + $0x390] sm:$0xff]  ;;  %v2159_v47 = vld [vmem:[%s4706_s2 + $0x398] sm:$0xff] }
 0x328   : > { %v526_v54 = vsel %vm515_vm1, %v486_v46, %v510_v21  ;;  %v538_v53 = vsel %vm515_vm1, %v510_v21, %v486_v46  ;;  %v2161_v46 = vld [vmem:[%s4706_s2 + $0x3a8] sm:$0xff]  ;;  %v460_v21 = vmul.f32 %v2159_v47, %v4024_v60 }
 0x329   : > { %v4210_v62 = vadd.f32 %v878_v25, %v756_v26  ;;  %v4212_v63 = vadd.f32 %v879_v22, %v757_v37  ;;  %v584_v42 = vmul.f32 %v560_v30, %v538_v53  ;;  %v585_v6 = vmul.f32 %v561_v11, %v526_v54  ;;  %v2183_v25 = vld [vmem:[%s4706_s2 + $0x158] sm:$0xff]  ;;  %v2206_v53 = vld [vmem:[%s4706_s2 + $0x210] sm:$0xff] }
 0x32a   : > { %v459_v22 = vmul.f32 %v2158_v55, %v4022_v8  ;;  %v2205_v55 = vld [vmem:[%s4706_s2 + $0x208] sm:$0xff] }
 0x32b   : > { %v608_v48 = vadd.f32 %v584_v42, %v461_v9 }
 0x32c   : > { %1236 = vrot.lane.b32.xlu2 %v4020_v20, %s2429_s16 }
 0x32d   : > { %1362 = vrot.lane.b32.xlu1 %v4029_v45, %s2431_s18  ;;  %v506_v14 = vpop.permute.xlu0 %505 }
 0x32e   : > { %v4218_v24 = vpop.permute.xlu2 %628 }
 0x32f   : > { %v484_v50 = vpop.permute.xlu1 %483 }
 0x330   : > { %v525_v31 = vsel %vm515_vm1, %v484_v50, %v508_v33  ;;  %v537_v36 = vsel %vm515_vm1, %v508_v33, %v484_v50 }
 0x331   : > { %v582_v2 = vmul.f32 %v558_v34, %v537_v36  ;;  %v583_v26 = vmul.f32 %v559_v23, %v525_v31  ;;  %v2204_v23 = vld [vmem:[%s4706_s2 + $0x200] sm:$0xff] }
 0x333   : > { %v606_v36 = vadd.f32 %v582_v2, %v459_v22  ;;  %v607_v30 = vadd.f32 %v583_v26, %v460_v21 }
 0x335   : > { %1534 = vrot.lane.b32.xlu1 %v4046_v19, %s2430_s17  ;;  %v779_v17 = vpop.permute.xlu0 %778  ;;  %v462_v19 = vmul.f32 %v2161_v46, %v4031_v13 }
 0x336   : > { %v817_v43 = vsel %vm806_vm3, %v779_v17, %v803_v29  ;;  %v829_v28 = vsel %vm806_vm3, %v803_v29, %v779_v17  ;;  %v801_v15 = vpop.permute.xlu2 %800  ;;  %v2182_v29 = vld [vmem:[%s4706_s2 + $0x150] sm:$0xff] }
 0x337   : > { %v657_v12 = vpop.permute.xlu1 %656  ;;  %v609_v56 = vadd.f32 %v585_v6, %v462_v19  ;;  %v876_v49 = vmul.f32 %v2208_v35, %v829_v28  ;;  %v877_v18 = vmul.f32 %v2209_v3, %v817_v43 }
 0x338   : > { %v671_v1 = vsel %vm660_vm2, %v4140_v0, %v657_v12  ;;  %v683_v33 = vsel %vm660_vm2, %v657_v12, %v4140_v0 }
 0x339   : > { %v730_v39 = vmul.f32 %v2184_v16, %v683_v33  ;;  %v731_v51 = vmul.f32 %v2185_v44, %v671_v1  ;;  %v2234_v44 = vld [vmem:[%s4706_s2 + $0x2f0] sm:$0xff]  ;;  %v556_v1 = vld [vmem:[%s4706_s2 + $0x80] sm:$0xff]  ;;  %v557_v33 = vld [vmem:[%s4706_s2 + $0x88] sm:$0xff] }
 0x33b   : > { %v754_v10 = vadd.f32 %v730_v39, %v608_v48  ;;  %v755_v59 = vadd.f32 %v731_v51, %v609_v56  ;;  %v2156_v51 = vld [vmem:[%s4706_s2 + $0x380] sm:$0xff] }
 0x33c   : > { %v457_v34 = vmul.f32 %v2156_v51, %v4018_v38 }
 0x33d   : > { %1360 = vrot.lane.b32.xlu1 %v4022_v8, %s2431_s18  ;;  %v951_v57 = vpop.permute.xlu0 %950  ;;  %v4264_v4 = vadd.f32 %v876_v49, %v754_v10  ;;  %v4266_v41 = vadd.f32 %v877_v18, %v755_v59  ;;  %v2157_v49 = vld [vmem:[%s4706_s2 + $0x388] sm:$0xff] }
 0x33e   : > { %v4268_v40 = vpop.permute.xlu2 %1072 }
 0x33f   : > { %v482_v32 = vpop.permute.xlu1 %481 }
 0x340   : > { %v524_v0 = vsel %vm515_vm1, %v482_v32, %v506_v14  ;;  %v536_v61 = vsel %vm515_vm1, %v506_v14, %v482_v32  ;;  %v2207_v14 = vld [vmem:[%s4706_s2 + $0x218] sm:$0xff]  ;;  %v2181_v32 = vld [vmem:[%s4706_s2 + $0x148] sm:$0xff] }
 0x341   : > { %v580_v18 = vmul.f32 %v556_v1, %v536_v61  ;;  %v581_v10 = vmul.f32 %v557_v33, %v524_v0  ;;  %v458_v61 = vmul.f32 %v2157_v49, %v4020_v20 }
 0x343   : > { %v604_v26 = vadd.f32 %v580_v18, %v457_v34 }
 0x345   : > { %v777_v37 = vpop.permute.xlu0 %776 }
 0x346   : > { %v816_v5 = vsel %vm806_vm3, %v777_v37, %v801_v15  ;;  %v828_v27 = vsel %vm806_vm3, %v801_v15, %v777_v37  ;;  %v799_v11 = vpop.permute.xlu2 %798  ;;  %v605_v37 = vadd.f32 %v581_v10, %v458_v61  ;;  %v2256_v10 = vld [vmem:[%s4706_s2 + $0x460] sm:$0xff] }
 0x347   : > { %v655_v54 = vpop.permute.xlu1 %654  ;;  %v874_v42 = vmul.f32 %v2206_v53, %v828_v27  ;;  %v875_v6 = vmul.f32 %v2207_v14, %v816_v5 }
 0x348   : > { %v670_v50 = vsel %vm660_vm2, %v4174_v52, %v655_v54  ;;  %v682_v31 = vsel %vm660_vm2, %v655_v54, %v4174_v52  ;;  %v2235_v52 = vld [vmem:[%s4706_s2 + $0x2f8] sm:$0xff] }
 0x349   : > { %v728_v58 = vmul.f32 %v2182_v29, %v682_v31  ;;  %v729_v46 = vmul.f32 %v2183_v25, %v670_v50  ;;  %v2232_v31 = vld [vmem:[%s4706_s2 + $0x2e0] sm:$0xff] }
 0x34b   : > { %v752_v17 = vadd.f32 %v728_v58, %v606_v36  ;;  %v753_v43 = vadd.f32 %v729_v46, %v607_v30 }
 0x34d   : > { %v949_v28 = vpop.permute.xlu0 %948  ;;  %v4310_v15 = vadd.f32 %v874_v42, %v752_v17  ;;  %v4312_v16 = vadd.f32 %v875_v6, %v753_v43 }
 0x34e   : > { %v4330_v48 = vpop.permute.xlu2 %1070 }
 0x34f   : > { %v927_v9 = vpop.permute.xlu1 %926 }
 0x350   : > { %v964_v19 = vsel %vm952_vm4, %v927_v9, %v951_v57  ;;  %v976_v12 = vsel %vm952_vm4, %v951_v57, %v927_v9  ;;  %v2230_v9 = vld [vmem:[%s4706_s2 + $0x2d0] sm:$0xff] }
 0x351   : > { %v1024_v35 = vmul.f32 %v2234_v44, %v976_v12  ;;  %v1025_v3 = vmul.f32 %v2235_v52, %v964_v19 }
 0x353   : > { %v4333_v56 = vadd.f32 %v1024_v35, %v4210_v62  ;;  %v4336_v39 = vadd.f32 %v1025_v3, %v4212_v63  ;;  %v2180_v63 = vld [vmem:[%s4706_s2 + $0x140] sm:$0xff] }
 0x355   : > { %v775_v59 = vpop.permute.xlu0 %774 }
 0x356   : > { %v815_v57 = vsel %vm806_vm3, %v775_v59, %v799_v11  ;;  %v827_v62 = vsel %vm806_vm3, %v799_v11, %v775_v59  ;;  %v4368_v54 = vpop.permute.xlu2 %1242  ;;  %v2257_v59 = vld [vmem:[%s4706_s2 + $0x468] sm:$0xff] }
 0x357   : > { %v653_v0 = vpop.permute.xlu1 %652  ;;  %v872_v29 = vmul.f32 %v2204_v23, %v827_v62  ;;  %v873_v25 = vmul.f32 %v2205_v55, %v815_v57 }
 0x358   : > { %v669_v47 = vsel %vm660_vm2, %v4218_v24, %v653_v0  ;;  %v681_v2 = vsel %vm660_vm2, %v653_v0, %v4218_v24  ;;  %v2233_v24 = vld [vmem:[%s4706_s2 + $0x2e8] sm:$0xff] }
 0x359   : > { %v726_v5 = vmul.f32 %v2180_v63, %v681_v2  ;;  %v727_v27 = vmul.f32 %v2181_v32, %v669_v47 }
 0x35b   : > { %v750_v22 = vadd.f32 %v726_v5, %v604_v26  ;;  %v751_v21 = vadd.f32 %v727_v27, %v605_v37  ;;  %v2228_v5 = vld [vmem:[%s4706_s2 + $0x2c0] sm:$0xff] }
 0x35d   : > { %v947_v53 = vpop.permute.xlu0 %946  ;;  %v896_v14 = vadd.f32 %v872_v29, %v750_v22  ;;  %v897_v50 = vadd.f32 %v873_v25, %v751_v21 }
 0x35e   : > { %v1069_v43 = vpop.permute.xlu2 %1068 }
 0x35f   : > { %v925_v36 = vpop.permute.xlu1 %924 }
 0x360   : > { %v963_v30 = vsel %vm952_vm4, %v925_v36, %v949_v28  ;;  %v975_v11 = vsel %vm952_vm4, %v949_v28, %v925_v36  ;;  %v2231_v28 = vld [vmem:[%s4706_s2 + $0x2d8] sm:$0xff] }
 0x361   : > { %v1022_v58 = vmul.f32 %v2232_v31, %v975_v11  ;;  %v1023_v46 = vmul.f32 %v2233_v24, %v963_v30 }
 0x363   : > { %v1046_v42 = vadd.f32 %v1022_v58, %v4264_v4  ;;  %v1047_v6 = vadd.f32 %v1023_v46, %v4266_v41  ;;  %v2254_v58 = vld [vmem:[%s4706_s2 + $0x450] sm:$0xff]  ;;  %v2255_v46 = vld [vmem:[%s4706_s2 + $0x458] sm:$0xff] }
 0x365   : > { %v4382_v17 = vpop.permute.xlu0 %1218 }
 0x366   : > { %v1241_v12 = vpop.permute.xlu2 %1240 }
 0x367   : > { %v4384_v44 = vpop.permute.xlu1 %1096 }
 0x36d   : > { %v945_v52 = vpop.permute.xlu0 %944 }
 0x36e   : > { %v1067_v61 = vpop.permute.xlu2 %1066 }
 0x36f   : > { %v923_v19 = vpop.permute.xlu1 %922 }
 0x370   : > { %v962_v4 = vsel %vm952_vm4, %v923_v19, %v947_v53  ;;  %v974_v41 = vsel %vm952_vm4, %v947_v53, %v923_v19  ;;  %v273_v19 = vld [vmem:[%s4708_s4] sm:$0xff] }
 0x371   : > { %v1020_v35 = vmul.f32 %v2230_v9, %v974_v41  ;;  %v1021_v3 = vmul.f32 %v2231_v28, %v962_v4 }
 0x373   : > { %v1044_v1 = vadd.f32 %v1020_v35, %v4310_v15  ;;  %v1045_v33 = vadd.f32 %v1021_v3, %v4312_v16  ;;  %v2280_v15 = vld [vmem:[%s4706_s2 + $0x520] sm:$0xff]  ;;  %v2281_v16 = vld [vmem:[%s4706_s2 + $0x528] sm:$0xff] }
 0x375   : > { %v1217_v51 = vpop.permute.xlu0 %1216 }
 0x376   : > { %v1255_v49 = vsel %vm1244_vm6, %v1217_v51, %v1241_v12  ;;  %v1267_v18 = vsel %vm1244_vm6, %v1241_v12, %v1217_v51  ;;  %v1239_v24 = vpop.permute.xlu2 %1238 }
 0x377   : > { %v1095_v57 = vpop.permute.xlu1 %1094  ;;  %v1314_v0 = vmul.f32 %v2280_v15, %v1255_v49  ;;  %v1315_v23 = vmul.f32 %v2281_v16, %v1267_v18  ;;  %v274_v15 = vld [vmem:[%s4708_s4 + $0x8] sm:$0xff] }
 0x378   : > { %v1109_v62 = vsel %vm1098_vm5, %v4330_v48, %v1095_v57  ;;  %v1121_v63 = vsel %vm1098_vm5, %v1095_v57, %v4330_v48  ;;  %v2229_v48 = vld [vmem:[%s4706_s2 + $0x2c8] sm:$0xff] }
 0x379   : > { %v1168_v32 = vmul.f32 %v2256_v10, %v1109_v62  ;;  %v1169_v34 = vmul.f32 %v2257_v59, %v1121_v63  ;;  %v2252_v62 = vld [vmem:[%s4706_s2 + $0x440] sm:$0xff]  ;;  %v2253_v63 = vld [vmem:[%s4706_s2 + $0x448] sm:$0xff] }
 0x37b   : > { %v1192_v55 = vadd.f32 %v1168_v32, %v1046_v42  ;;  %v1193_v47 = vadd.f32 %v1169_v34, %v1047_v6 }
 0x37d   : > { %v4420_v2 = vpop.permute.xlu0 %1388  ;;  %v4422_v26 = vadd.f32 %v1314_v0, %v1192_v55  ;;  %v4424_v37 = vadd.f32 %v1315_v23, %v1193_v47 }
 0x37f   : > { %v921_v27 = vpop.permute.xlu1 %920 }
 0x380   : > { %v961_v29 = vsel %vm952_vm4, %v921_v27, %v945_v52  ;;  %v973_v25 = vsel %vm952_vm4, %v945_v52, %v921_v27  ;;  %v275_v27 = vld [vmem:[%s4708_s4 + $0x10] sm:$0xff] }
 0x381   : > { %v1018_v22 = vmul.f32 %v2228_v5, %v973_v25  ;;  %v1019_v21 = vmul.f32 %v2229_v48, %v961_v29  ;;  %v2258_v29 = vld [vmem:[%s4706_s2 + $0x470] sm:$0xff]  ;;  %v1110_v25 = vsel %vm1098_vm5, %v4268_v40, %v4384_v44 }
 0x383   : > { %v1042_v53 = vadd.f32 %v1018_v22, %v896_v14  ;;  %v1043_v31 = vadd.f32 %v1019_v21, %v897_v50  ;;  %v2278_v14 = vld [vmem:[%s4706_s2 + $0x510] sm:$0xff]  ;;  %v2279_v50 = vld [vmem:[%s4706_s2 + $0x518] sm:$0xff]  ;;  %v1122_v22 = vsel %vm1098_vm5, %v4384_v44, %v4268_v40 }
 0x385   : > { %v1215_v36 = vpop.permute.xlu0 %1214 }
 0x386   : > { %v1254_v30 = vsel %vm1244_vm6, %v1215_v36, %v1239_v24  ;;  %v1266_v11 = vsel %vm1244_vm6, %v1239_v24, %v1215_v36 }
 0x387   : > { %v1093_v42 = vpop.permute.xlu1 %1092  ;;  %v1312_v4 = vmul.f32 %v2278_v14, %v1254_v30  ;;  %v1313_v41 = vmul.f32 %v2279_v50, %v1266_v11  ;;  %v2304_v30 = vld [vmem:[%s4706_s2 + $0x5e0] sm:$0xff]  ;;  %v2305_v11 = vld [vmem:[%s4706_s2 + $0x5e8] sm:$0xff] }
 0x388   : > { %v1108_v6 = vsel %vm1098_vm5, %v1069_v43, %v1093_v42  ;;  %v1120_v52 = vsel %vm1098_vm5, %v1093_v42, %v1069_v43 }
 0x389   : > { %v1166_v9 = vmul.f32 %v2254_v58, %v1108_v6  ;;  %v1167_v28 = vmul.f32 %v2255_v46, %v1120_v52  ;;  %v1170_v58 = vmul.f32 %v2258_v29, %v1110_v25  ;;  %v1256_v6 = vsel %vm1244_vm6, %v4382_v17, %v4368_v54 }
 0x38b   : > { %v1190_v12 = vadd.f32 %v1166_v9, %v1044_v1  ;;  %v1191_v35 = vadd.f32 %v1167_v28, %v1045_v33  ;;  %v1819_v3 = vpop.f32.mrf.mxu2  ;;  %v1848_v51 = vpop.f32.mrf.mxu3  ;;  %v2283_v28 = vld [vmem:[%s4706_s2 + $0x538] sm:$0xff] }
 0x38c   : > { %v1820_v49 = vadd.f32 %v1819_v3, %v273_v19  ;;  %v1268_v19 = vsel %vm1244_vm6, %v4368_v54, %v4382_v17  ;;  %v1194_v54 = vadd.f32 %v1170_v58, %v4333_v56  ;;  %v2331_v56 = vld [vmem:[%s4706_s2 + $0x6b8] sm:$0xff] }
 0x38d   : > { %v4459_v18 = vadd.f32 %v1312_v4, %v1190_v12  ;;  %v4461_v10 = vadd.f32 %v1313_v41, %v1191_v35  ;;  %v1387_v24 = vpop.permute.xlu0 %1386  ;;  %v2306_v4 = vld [vmem:[%s4706_s2 + $0x5f0] sm:$0xff]  ;;  %v2307_v41 = vld [vmem:[%s4706_s2 + $0x5f8] sm:$0xff] }
 0x38e   : > { %v4463_v59 = vadd.f32 %v1848_v51, %v1820_v49 }
 0x38f   : > { %v1365_v43 = vpop.permute.xlu1 %1364 }
 0x390   : > { %v1860_v57 = vsel %vm319_vm0, %v4463_v59, -inf  ;;  %v1402_v12 = vsel %vm1390_vm7, %v1365_v43, %v4420_v2  ;;  %v1414_v35 = vsel %vm1390_vm7, %v4420_v2, %v1365_v43  ;;  %v2330_v2 = vld [vmem:[%s4706_s2 + $0x6b0] sm:$0xff] }
 0x391   : > { %1861 = vmax.xlane.f32.xlu2 %v1860_v57 }
 0x395   : > { %v1822_v1 = vpop.f32.mrf.mxu2  ;;  %v1851_v33 = vpop.f32.mrf.mxu3 }
 0x396   : > { %v1823_v16 = vadd.f32 %v1822_v1, %v274_v15  ;;  %v1317_v15 = vmul.f32 %v2283_v28, %v1268_v19  ;;  %v1462_v1 = vmul.f32 %v2306_v4, %v1402_v12  ;;  %v2302_v4 = vld [vmem:[%s4706_s2 + $0x5d0] sm:$0xff] }
 0x397   : > { %v1091_v32 = vpop.permute.xlu1 %1090 }
 0x398   : > { %v4476_v34 = vadd.f32 %v1851_v33, %v1823_v16  ;;  %v1107_v0 = vsel %vm1098_vm5, %v1067_v61, %v1091_v32  ;;  %v1119_v23 = vsel %vm1098_vm5, %v1091_v32, %v1067_v61  ;;  %v2259_v61 = vld [vmem:[%s4706_s2 + $0x478] sm:$0xff]  ;;  %v1463_v33 = vmul.f32 %v2307_v41, %v1414_v35 }
 0x399   : > { %v1164_v55 = vmul.f32 %v2252_v62, %v1107_v0  ;;  %v1165_v47 = vmul.f32 %v2253_v63, %v1119_v23  ;;  %v1171_v46 = vmul.f32 %v2259_v61, %v1122_v22  ;;  %v2303_v41 = vld [vmem:[%s4706_s2 + $0x5d8] sm:$0xff] }
 0x39a   : > { %v1863_v5 = vsel %vm319_vm0, %v4476_v34, -inf }
 0x39b   : > { %v4484_v48 = vadd.f32 %v1164_v55, %v1042_v53  ;;  %1864 = vmax.xlane.f32.xlu1 %v1863_v5  ;;  %v4503_v21 = vadd.f32 %v1165_v47, %v1043_v31  ;;  %v2282_v31 = vld [vmem:[%s4706_s2 + $0x530] sm:$0xff]  ;;  %v1195_v17 = vadd.f32 %v1171_v46, %v4336_v39  ;;  %v1511_v39 = vpop.permute.xlu2 %1510 }
 0x39c   : > { %v1316_v57 = vmul.f32 %v2282_v31, %v1256_v6 }
 0x39d   : > { %v1825_v53 = vpop.f32.mrf.mxu2  ;;  %v1854_v42 = vpop.f32.mrf.mxu3 }
 0x39e   : > { %v1826_v36 = vadd.f32 %v1825_v53, %v275_v27  ;;  %v1340_v16 = vadd.f32 %v1316_v57, %v1194_v54 }
 0x39f   : > { %v1363_v14 = vpop.permute.xlu1 %1362 }
 0x3a0   : > { %v4511_v50 = vadd.f32 %v1854_v42, %v1826_v36  ;;  %v1401_v40 = vsel %vm1390_vm7, %v1363_v14, %v1387_v24  ;;  %v1413_v44 = vsel %vm1390_vm7, %v1387_v24, %v1363_v14  ;;  %v1486_v0 = vadd.f32 %v1462_v1, %v1340_v16  ;;  %v1213_v24 = vpop.permute.xlu0 %1212 }
 0x3a1   : > { %v1460_v52 = vmul.f32 %v2304_v30, %v1401_v40  ;;  %v1461_v9 = vmul.f32 %v2305_v11, %v1413_v44 }
 0x3a2   : > { %v1866_v3 = vsel %vm319_vm0, %v4511_v50, -inf }
 0x3a3   : > { %1867 = vmax.xlane.f32.xlu0 %v1866_v3  ;;  %v4548_v51 = vadd.f32 %v1460_v52, %v4422_v26  ;;  %v4551_v49 = vadd.f32 %v1461_v9, %v4424_v37  ;;  %v1341_v26 = vadd.f32 %v1317_v15, %v1195_v17 }
 0x3a5   : > { %v1487_v23 = vadd.f32 %v1463_v33, %v1341_v26  ;;  %v1828_v5 = vpop.f32.mrf.mxu2  ;;  %v1857_v29 = vpop.f32.mrf.mxu3 }
 0x3a7   : > { %v1535_v43 = vpop.permute.xlu1 %1534 }
 0x3a8   : > { %v1548_v37 = vsel %vm1536_vm8, %v1511_v39, %v1535_v43  ;;  %v1560_v62 = vsel %vm1536_vm8, %v1535_v43, %v1511_v39 }
 0x3a9   : > { %v1608_v63 = vmul.f32 %v2330_v2, %v1548_v37  ;;  %v1609_v32 = vmul.f32 %v2331_v56, %v1560_v62  ;;  %1508 = vrot.lane.b32.xlu2 %v4029_v45, %s2430_s17  ;;  %v276_v45 = vld [vmem:[%s4708_s4 + $0x18] sm:$0xff]  ;;  %v2326_v37 = vld [vmem:[%s4706_s2 + $0x690] sm:$0xff] }
 0x3aa   : > { %v1829_v27 = vadd.f32 %v1828_v5, %v276_v45  ;;  %v2300_v5 = vld [vmem:[%s4706_s2 + $0x5c0] sm:$0xff] }
 0x3ab   : > { %v1632_v55 = vadd.f32 %v1608_v63, %v1486_v0  ;;  %v1633_v47 = vadd.f32 %v1609_v32, %v1487_v23  ;;  %v2276_v32 = vld [vmem:[%s4706_s2 + $0x500] sm:$0xff] }
 0x3ad   : > { %1928 = vmatpush.msrb.mxu2 %v1632_v55  ;;  %1957 = vmatpush.msrb.mxu3 %v1633_v47  ;;  %v2277_v47 = vld [vmem:[%s4706_s2 + $0x508] sm:$0xff] }
 0x3af   : > { %v1361_v53 = vpop.permute.xlu1 %1360 }
 0x3b4   : > { %1532 = vrot.lane.b32.xlu1 %v4031_v13, %s2430_s17  ;;  %v1858_v13 = vadd.f32 %v1857_v29, %v1829_v27  ;;  %v2301_v27 = vld [vmem:[%s4706_s2 + $0x5c8] sm:$0xff] }
 0x3b6   : > { %v1869_v61 = vsel %vm319_vm0, %v1858_v13, -inf }
 0x3b7   : > { %1384 = vrot.lane.b32.xlu0 %v4024_v60, %s2431_s18 }
 0x3bc   : > { %1382 = vrot.lane.b32.xlu1 %v4020_v20, %s2431_s18 }
 0x3c4   : > { %1530 = vrot.lane.b32.xlu1 %v4024_v60, %s2430_s17  ;;  %v4585_v60 = vpop.permute.xlu2 %1236 }
 0x3c5   : > { %v1253_v0 = vsel %vm1244_vm6, %v1213_v24, %v4585_v60  ;;  %v1265_v45 = vsel %vm1244_vm6, %v4585_v60, %v1213_v24  ;;  %v2324_v24 = vld [vmem:[%s4706_s2 + $0x680] sm:$0xff] }
 0x3cc   : > { %1528 = vrot.lane.b32.xlu1 %v4020_v20, %s2430_s17 }
 0x3d2   : > { %1870 = vmax.xlane.f32.xlu2 %v1869_v61 }
 0x3ea   : > { %1358 = vrot.lane.b32.xlu2 %v4018_v38, %s2431_s18 }
 0x3f2   : > { %1506 = vrot.lane.b32.xlu2 %v4022_v8, %s2430_s17 }
 0x3fa   : > { %1504 = vrot.lane.b32.xlu2 %v4018_v38, %s2430_s17 }
 0x404   : > { %v1862_v25 = vpop.xlane.xlu2 %1861 }
 0x405   : > { %v1872_v22 = vsub.f32 %v4463_v59, %v1862_v25 }
 0x407   : > { %v1876_v20 = vmul.f32 1.442695, %v1872_v22  ;;  %v1310_v22 = vmul.f32 %v2276_v32, %v1253_v0 }
 0x409   : > { %2400 = vpow2.f32 %v1876_v20 }
 0x40c   : > { %v1509_v31 = vpop.permute.xlu2 %1508 }
 0x40e   : > { %v1865_v36 = vpop.xlane.xlu1 %1864 }
 0x40f   : > { %v4588_v30 = vpop.eup %2400  ;;  %v1873_v8 = vsub.f32 %v4476_v34, %v1865_v36  ;;  %v2328_v34 = vld [vmem:[%s4706_s2 + $0x6a0] sm:$0xff]  ;;  %v2325_v36 = vld [vmem:[%s4706_s2 + $0x688] sm:$0xff] }
 0x410   : > { %v1884_v11 = vsel %vm319_vm0, %v4588_v30, 0.0 }
 0x411   : > { %1885 = vadd.xlane.f32.xlu0 %v1884_v11  ;;  %v1878_v58 = vmul.f32 1.442695, %v1873_v8 }
 0x413   : > { %2402 = vpow2.f32 %v1878_v58  ;;  %v1334_v58 = vadd.f32 %v1310_v22, %v4484_v48 }
 0x416   : > { %v1868_v38 = vpop.xlane.xlu0 %1867 }
 0x417   : > { %v1874_v46 = vsub.f32 %v4511_v50, %v1868_v38  ;;  %v2329_v50 = vld [vmem:[%s4706_s2 + $0x6a8] sm:$0xff] }
 0x419   : > { %v1880_v42 = vmul.f32 1.442695, %v1874_v46  ;;  %v4594_v59 = vpop.eup %2402 }
 0x41a   : > { %v1887_v44 = vsel %vm319_vm0, %v4594_v59, 0.0 }
 0x41b   : > { %2404 = vpow2.f32 %v1880_v42 }
 0x421   : > { %v4596_v14 = vpop.eup %2404 }
 0x422   : > { %v1890_v40 = vsel %vm319_vm0, %v4596_v14, 0.0 }
 0x423   : > { %1891 = vadd.xlane.f32.xlu1 %v1890_v40  ;;  %1888 = vadd.xlane.f32.xlu2 %v1887_v44 }
 0x426   : > { %v1533_v6 = vpop.permute.xlu1 %1532 }
 0x427   : > { %v1547_v52 = vsel %vm1536_vm8, %v1509_v31, %v1533_v6  ;;  %v1559_v9 = vsel %vm1536_vm8, %v1533_v6, %v1509_v31 }
 0x428   : > { %v1606_v28 = vmul.f32 %v2328_v34, %v1547_v52  ;;  %v1607_v19 = vmul.f32 %v2329_v50, %v1559_v9 }
 0x429   : > { %v1385_v12 = vpop.permute.xlu0 %1384 }
 0x42a   : > { %v1400_v35 = vsel %vm1390_vm7, %v1361_v53, %v1385_v12  ;;  %v1412_v3 = vsel %vm1390_vm7, %v1385_v12, %v1361_v53  ;;  %v1630_v54 = vadd.f32 %v1606_v28, %v4548_v51  ;;  %v1631_v17 = vadd.f32 %v1607_v19, %v4551_v49 }
 0x42b   : > { %v1458_v57 = vmul.f32 %v2302_v4, %v1400_v35  ;;  %v1459_v15 = vmul.f32 %v2303_v41, %v1412_v3  ;;  %v1311_v53 = vmul.f32 %v2277_v47, %v1265_v45 }
 0x42c   : > { %1929 = vmatpush.msrb.mxu2 %v1630_v54  ;;  %1958 = vmatpush.msrb.mxu3 %v1631_v17 }
 0x42d   : > { %v1482_v1 = vadd.f32 %v1458_v57, %v4459_v18  ;;  %v1483_v33 = vadd.f32 %v1459_v15, %v4461_v10  ;;  %v2327_v18 = vld [vmem:[%s4706_s2 + $0x698] sm:$0xff]  ;;  %v1335_v38 = vadd.f32 %v1311_v53, %v4503_v21 }
 0x42e   : > { %v1383_v43 = vpop.permute.xlu1 %1382 }
 0x436   : > { %v1531_v49 = vpop.permute.xlu1 %1530 }
 0x43e   : > { %v1529_v11 = vpop.permute.xlu1 %1528 }
 0x445   : > { %v1871_v2 = vpop.xlane.xlu2 %1870 }
 0x446   : > { %v1875_v56 = vsub.f32 %v1858_v13, %v1871_v2 }
 0x448   : > { %v1882_v39 = vmul.f32 1.442695, %v1875_v56 }
 0x44a   : > { %2406 = vpow2.f32 %v1882_v39 }
 0x44d   : > { %v1359_v16 = vpop.permute.xlu2 %1358 }
 0x44e   : > { %v1399_v29 = vsel %vm1390_vm7, %v1359_v16, %v1383_v43  ;;  %v1411_v13 = vsel %vm1390_vm7, %v1383_v43, %v1359_v16  ;;  %v2362_v43 = vld [vmem:[%s4709_s5] sm:$0xff]  ;;  %v2363_v16 = vld [vmem:[%s4709_s5 + $0x8] sm:$0xff] }
 0x44f   : > { %v1456_v20 = vmul.f32 %v2300_v5, %v1399_v29  ;;  %v1457_v60 = vmul.f32 %v2301_v27, %v1411_v13 }
 0x450   : > { %v4626_v26 = vpop.eup %2406 }
 0x451   : > { %v1893_v51 = vsel %vm319_vm0, %v4626_v26, 0.0  ;;  %v1480_v34 = vadd.f32 %v1456_v20, %v1334_v58  ;;  %v1481_v50 = vadd.f32 %v1457_v60, %v1335_v38 }
 0x452   : > { %1894 = vadd.xlane.f32.xlu0 %v1893_v51 }
 0x455   : > { %v1507_v10 = vpop.permute.xlu2 %1506 }
 0x456   : > { %v1546_v62 = vsel %vm1536_vm8, %v1507_v10, %v1531_v49  ;;  %v1558_v63 = vsel %vm1536_vm8, %v1531_v49, %v1507_v10 }
 0x457   : > { %v1604_v23 = vmul.f32 %v2326_v37, %v1546_v62  ;;  %v1605_v55 = vmul.f32 %v2327_v18, %v1558_v63 }
 0x459   : > { %v1628_v61 = vadd.f32 %v1604_v23, %v1482_v1  ;;  %v1629_v25 = vadd.f32 %v1605_v55, %v1483_v33 }
 0x45b   : > { %1930 = vmatpush.msrb.mxu2 %v1628_v61  ;;  %1959 = vmatpush.msrb.mxu3 %v1629_v25 }
 0x45d   : > { %v1505_v8 = vpop.permute.xlu2 %1504 }
 0x45e   : > { %v1545_v46 = vsel %vm1536_vm8, %v1505_v8, %v1529_v11  ;;  %v1557_v42 = vsel %vm1536_vm8, %v1529_v11, %v1505_v8 }
 0x45f   : > { %v1602_v40 = vmul.f32 %v2324_v24, %v1545_v46  ;;  %v1603_v44 = vmul.f32 %v2325_v36, %v1557_v42 }
 0x461   : > { %v1626_v31 = vadd.f32 %v1602_v40, %v1480_v34  ;;  %v1627_v6 = vadd.f32 %v1603_v44, %v1481_v50 }
 0x463   : > { %1931 = vmatpush.msrb.mxu2 %v1626_v31  ;;  %1960 = vmatpush.msrb.mxu3 %v1627_v6 }
 0x484   : > { %v1886_v52 = vpop.xlane.xlu0 %1885 }
 0x485   : > { %2408 = vrcp.f32 %v1886_v52 }
 0x48b   : > { %v2409_v9 = vpop.eup %2408 }
 0x48c   : > { %v1900_v48 = vmul.f32 %v2409_v9, %v4588_v30 }
 0x48e   : > { %2332 = vmatmul.msk.f32.vlgmr.msrb.gmra.mxu2 %vm319_vm0, %v1900_v48  ;;  %2336 = vmatmul.msk.f32.vlgmr.msrb.gmra.mxu3 %vm319_vm0, %v1900_v48 }
 0x496   : > { %v1889_v21 = vpop.xlane.xlu2 %1888  ;;  %v1892_v7 = vpop.xlane.xlu1 %1891 }
 0x497   : > { %2410 = vrcp.f32 %v1889_v21 }
 0x498   : > { %2412 = vrcp.f32 %v1892_v7 }
 0x49d   : > { %v2411_v28 = vpop.eup %2410 }
 0x49e   : > { %v1901_v19 = vmul.f32 %v2411_v28, %v4594_v59  ;;  %v2413_v4 = vpop.eup %2412 }
 0x49f   : > { %v1902_v41 = vmul.f32 %v2413_v4, %v4596_v14 }
 0x4a0   : > { %2333 = vmatmul.msk.f32.gmra.mxu2 %vm319_vm0, %v1901_v19  ;;  %2337 = vmatmul.msk.f32.gmra.mxu3 %vm319_vm0, %v1901_v19 }
 0x4a8   : > { %2334 = vmatmul.msk.f32.gmra.mxu2 %vm319_vm0, %v1902_v41  ;;  %2338 = vmatmul.msk.f32.gmra.mxu3 %vm319_vm0, %v1902_v41 }
 0x4c5   : > { %v1895_v30 = vpop.xlane.xlu0 %1894 }
 0x4c6   : > { %2414 = vrcp.f32 %v1895_v30 }
 0x4cc   : > { %v2415_v12 = vpop.eup %2414 }
 0x4cd   : > { %v1903_v35 = vmul.f32 %v2415_v12, %v4626_v26 }
 0x4cf   : > { %2335 = vmatmul.msk.f32.gmra.mxu2 %vm319_vm0, %v1903_v35  ;;  %2339 = vmatmul.msk.f32.gmra.mxu3 %vm319_vm0, %v1903_v35 }
 0x511   : > { %v1933_v59 = vpop.f32.mrf.mxu2  ;;  %v1962_v3 = vpop.f32.mrf.mxu3 }
 0x523   : > { %v1936_v54 = vpop.f32.mrf.mxu2  ;;  %v1965_v17 = vpop.f32.mrf.mxu3 }
 0x524   : > { %v1974_v56 = vpack.c.bf16 %v1936_v54, %v1933_v59  ;;  %v1975_v39 = vpack.c.bf16 %v1965_v17, %v1962_v3 }
 0x52b   : > { %v1939_v57 = vpop.f32.mrf.mxu2  ;;  %v1968_v15 = vpop.f32.mrf.mxu3 }
 0x552   : > { %v1942_v14 = vpop.f32.mrf.mxu2  ;;  %v1971_v1 = vpop.f32.mrf.mxu3 }
 0x553   : > { %v1976_v33 = vpack.c.bf16 %v1942_v14, %v1939_v57  ;;  %v1977_v2 = vpack.c.bf16 %v1971_v1, %v1968_v15 }
 0x555   : > { %2000 = vmatpush.bf16.msra.mxu2 %v1976_v33  ;;  %2019 = vmatpush.bf16.msra.mxu3 %v1977_v2 }
 0x559   : > { %2001 = vmatpush.bf16.msra.mxu2 %v1974_v56  ;;  %2020 = vmatpush.bf16.msra.mxu3 %v1975_v39 }
 0x55c   : > { %2348 = vmatmul.msk.bf16.vlgmr.msra.gmra.mxu2 %vm319_vm0, %v2362_v43  ;;  %2350 = vmatmul.msk.bf16.vlgmr.msra.gmra.mxu3 %vm319_vm0, %v2362_v43 }
 0x56c   : > { %2349 = vmatmul.msk.bf16.gmra.mxu2 %vm319_vm0, %v2363_v16  ;;  %2351 = vmatmul.msk.bf16.gmra.mxu3 %vm319_vm0, %v2363_v16 }
 0x5df   : > { %v2003_v26 = vpop.f32.mrf.mxu2  ;;  %v2022_v51 = vpop.f32.mrf.mxu3 }
 0x5e0   : > { %2032 = vst [vmem:[%s251_s13] sm:$0xff] %v2003_v26 }
 0x5e1   : > { %2033 = vst [vmem:[%s251_s13 + $0x8] sm:$0xff] %v2022_v51 }
 0x5e7   : > { %v2005_v49 = vpop.f32.mrf.mxu2  ;;  %v2024_v37 = vpop.f32.mrf.mxu3 }
 0x5e8   : > { %2034 = vst [vmem:[%s251_s13 + $0x10] sm:$0xff] %v2005_v49 }
 0x5e9   : > { %2035 = vst [vmem:[%s251_s13 + $0x18] sm:$0xff] %v2024_v37 }
 0x5ef   : > { %v2008_v18 = vpop.f32.mrf.mxu2  ;;  %v2027_v10 = vpop.f32.mrf.mxu3 }
 0x5f0   : > { %2036 = vst [vmem:[%s251_s13 + $0x20] sm:$0xff] %v2008_v18 }
 0x5f1   : > { %2037 = vst [vmem:[%s251_s13 + $0x28] sm:$0xff] %v2027_v10 }
 0x5f7   : > { %v2010_v62 = vpop.f32.mrf.mxu2  ;;  %v2029_v63 = vpop.f32.mrf.mxu3 }
 0x5f8   : > { %2038 = vst [vmem:[%s251_s13 + $0x30] sm:$0xff] %v2010_v62 }
 0x5f9   : > { %2039 = vst [vmem:[%s251_s13 + $0x38] sm:$0xff] %v2029_v63 }
 0x5fa PF: > { %s16_s21 = sadd.s32 1, %s2422_s21  }
 0x5fb   : > { %p13_p4 = scmp.ge.s32.totalorder %s16_s21, 4  }
 0x5fd   :  { %15 = sbr.rel (!%p13_p4) target bundleno = 1 (0x1), region = 82 }

</bundles_post_ra>
